<compile_context>
chip_gen: v7x
topology: tpu7x:2x2x1
jax: 0.10.0
libtpu: 0.0.40
codegen_flags: <defaults>
</compile_context>

<pallas_src>
import jax
import jax.numpy as jnp
import numpy as np
from jax.experimental import pallas as pl
from jax.experimental.pallas import tpu as pltpu


TN = 256     # node-row tile (sublane axis)
TK = 256     # node-col tile (adjacency lane axis / contraction dim)
FPAD = 128   # padded feature / hidden / proj width (lane-dense)
B_PAD = 8    # padded number of graphs (sublane-dense pooled output)

assert TN == TK, "row tiles and col blocks must align for the band schedule"


def _round_up(n, m):
    return (n + m - 1) // m * m


def _widen_adj(a_i8):
    # int8 HBM storage halves adjacency DMA bytes; widen on-chip
    # (i8 -> i32 -> f32 -> bf16) so the MXU runs bf16 x bf16 -> f32.
    return a_i8.astype(jnp.int32).astype(jnp.float32).astype(jnp.bfloat16)


# ---------------------------------------------------------------------------
# Kernel 1: one GIN layer   h = relu( (Ahat @ x) @ W + b )
# Flattened visited-block schedule: step p handles adjacency block
# (row[p], col[p]); first/last flags gate accumulator init / epilogue.
# ---------------------------------------------------------------------------
def _gin_layer_kernel(row_ref, col_ref, first_ref, last_ref,   # SMEM schedule
                      adj_ref, x_ref, w_ref, b_ref,            # VMEM tiles
                      h_ref,                                    # output tile
                      acc_ref):                                 # f32 scratch
    p = pl.program_id(0)

    @pl.when(first_ref[p] == 1)
    def _():
        acc_ref[...] = jnp.zeros_like(acc_ref)

    acc_ref[...] += jnp.dot(_widen_adj(adj_ref[...]), x_ref[...],
                            preferred_element_type=jnp.float32)

    @pl.when(last_ref[p] == 1)
    def _():
        agg = acc_ref[...].astype(jnp.bfloat16)
        h = jnp.dot(agg, w_ref[...],
                    preferred_element_type=jnp.float32) + b_ref[...]
        h_ref[...] = jnp.maximum(h, 0.0).astype(h_ref.dtype)


def gin_layer(adj_i8, x, w, b, sched):
    """adj_i8: (Np,Np) int8, x: (Np,Fin) bf16, w: (Fin,Fout) bf16, b: (1,Fout) f32."""
    row, col, first, last = sched
    n_pad = adj_i8.shape[0]
    f_in, f_out = x.shape[1], w.shape[1]
    steps = int(row.shape[0])

    cost = pl.CostEstimate(
        flops=int(2 * steps * TN * TK * f_in + 2 * n_pad * f_in * f_out),
        transcendentals=0,
        bytes_accessed=int(steps * (TN * TK * 1 + TK * f_in * 2)
                           + f_in * f_out * 2 + f_out * 4
                           + n_pad * f_out * 2),
    )

    grid_spec = pltpu.PrefetchScalarGridSpec(
        num_scalar_prefetch=4,
        grid=(steps,),
        in_specs=[
            pl.BlockSpec((TN, TK), lambda p, r, c, *_: (r[p], c[p])),
            pl.BlockSpec((TK, f_in), lambda p, r, c, *_: (c[p], 0)),
            pl.BlockSpec((f_in, f_out), lambda p, *_: (0, 0)),
            pl.BlockSpec((1, f_out), lambda p, *_: (0, 0)),
        ],
        out_specs=pl.BlockSpec((TN, f_out), lambda p, r, *_: (r[p], 0)),
        scratch_shapes=[pltpu.VMEM((TN, f_in), jnp.float32)],
    )
    # NOTE(v7x): single "arbitrary" axis -> one TensorCore.  Megacore
    # refinement: split the schedule into two per-core lists behind a leading
    # size-2 "parallel" axis (row tiles must not be shared across cores).
    return pl.pallas_call(
        _gin_layer_kernel,
        out_shape=jax.ShapeDtypeStruct((n_pad, f_out), jnp.bfloat16),
        grid_spec=grid_spec,
        compiler_params=pltpu.CompilerParams(
            dimension_semantics=("arbitrary",)),
        cost_estimate=cost,
    )(row, col, first, last, adj_i8, x, w, b)


# ---------------------------------------------------------------------------
# Kernel 2: GIN layer fused with the global-mean-pool partial.
# Same accumulation as kernel 1; the epilogue never writes h to HBM — it
# emits pool_block @ h as a per-row-tile (B_pad, Fout) partial instead.
# ---------------------------------------------------------------------------
def _gin_pool_layer_kernel(row_ref, col_ref, first_ref, last_ref,
                           adj_ref, x_ref, w_ref, b_ref, pool_ref,
                           part_ref, acc_ref):
    p = pl.program_id(0)

    @pl.when(first_ref[p] == 1)
    def _():
        acc_ref[...] = jnp.zeros_like(acc_ref)

    acc_ref[...] += jnp.dot(_widen_adj(adj_ref[...]), x_ref[...],
                            preferred_element_type=jnp.float32)

    @pl.when(last_ref[p] == 1)
    def _():
        agg = acc_ref[...].astype(jnp.bfloat16)
        h = jnp.maximum(
            jnp.dot(agg, w_ref[...],
                    preferred_element_type=jnp.float32) + b_ref[...],
            0.0)                                            # (TN, Fout) f32
        # f32 pool weights: exact zeros for padded nodes, exact 1/|V_g|.
        part_ref[0] = jnp.dot(pool_ref[...], h,
                              preferred_element_type=jnp.float32)


def gin_pool_layer(adj_i8, x, w, b, pool_mat, sched):
    row, col, first, last = sched
    n_pad = adj_i8.shape[0]
    f_in, f_out = x.shape[1], w.shape[1]
    b_pad = pool_mat.shape[0]
    steps = int(row.shape[0])
    n_row_tiles = n_pad // TN

    cost = pl.CostEstimate(
        flops=int(2 * steps * TN * TK * f_in
                  + 2 * n_pad * f_in * f_out
                  + 2 * n_row_tiles * b_pad * TN * f_out),
        transcendentals=0,
        bytes_accessed=int(steps * (TN * TK * 1 + TK * f_in * 2)
                           + f_in * f_out * 2 + f_out * 4
                           + b_pad * n_pad * 4
                           + n_row_tiles * b_pad * f_out * 4),
    )

    grid_spec = pltpu.PrefetchScalarGridSpec(
        num_scalar_prefetch=4,
        grid=(steps,),
        in_specs=[
            pl.BlockSpec((TN, TK), lambda p, r, c, *_: (r[p], c[p])),
            pl.BlockSpec((TK, f_in), lambda p, r, c, *_: (c[p], 0)),
            pl.BlockSpec((f_in, f_out), lambda p, *_: (0, 0)),
            pl.BlockSpec((1, f_out), lambda p, *_: (0, 0)),
            pl.BlockSpec((b_pad, TN), lambda p, r, *_: (0, r[p])),
        ],
        out_specs=pl.BlockSpec((1, b_pad, f_out),
                               lambda p, r, *_: (r[p], 0, 0)),
        scratch_shapes=[pltpu.VMEM((TN, f_in), jnp.float32)],
    )
    return pl.pallas_call(
        _gin_pool_layer_kernel,
        out_shape=jax.ShapeDtypeStruct((n_row_tiles, b_pad, f_out),
                                       jnp.float32),
        grid_spec=grid_spec,
        compiler_params=pltpu.CompilerParams(
            dimension_semantics=("arbitrary",)),
        cost_estimate=cost,
    )(row, col, first, last, adj_i8, x, w, b, pool_mat)


# ---------------------------------------------------------------------------
# Kernel 3 (tiny, gridless): reduce pool partials + 2-layer projection head.
#   z = relu( sum_tiles(partials) @ W3 + b3 ) @ W4 + b4
# ---------------------------------------------------------------------------
def _head_kernel(part_ref, w3_ref, b3_ref, w4_ref, b4_ref, out_ref):
    hg = jnp.sum(part_ref[...], axis=0)                     # (B_pad, hid) f32
    p1 = jnp.maximum(
        jnp.dot(hg.astype(jnp.bfloat16), w3_ref[...],
                preferred_element_type=jnp.float32) + b3_ref[...],
        0.0)
    out_ref[...] = (jnp.dot(p1.astype(jnp.bfloat16), w4_ref[...],
                            preferred_element_type=jnp.float32)
                    + b4_ref[...])


def proj_head(partials, w3, b3, w4, b4):
    b_pad = partials.shape[1]
    pdim = w4.shape[1]
    return pl.pallas_call(
        _head_kernel,
        out_shape=jax.ShapeDtypeStruct((b_pad, pdim), jnp.float32),
    )(partials, w3, b3, w4, b4)


def gnn_forward(x, adj_i8, pool_mat, params, sched):
    w1, b1, w2, b2, w3, b3, w4, b4 = params
    h1 = gin_layer(adj_i8, x, w1, b1, sched)                    # GINConv1+ReLU
    parts = gin_pool_layer(adj_i8, h1, w2, b2, pool_mat, sched)  # GINConv2+ReLU+pool
    return proj_head(parts, w3, b3, w4, b4)                      # head


# ---------------------------------------------------------------------------
# Host-side glue: dense operators, padding, flattened block schedule
# ---------------------------------------------------------------------------
def build_adjacency_int8(edge_index, num_nodes, n_pad, eps=0.0):
    """Ahat[dst, src] += 1 per edge; (1 + eps) on the diagonal; zero padding."""
    assert float(eps) == 0.0, "int8 adjacency requires integer self-weight"
    src, dst = edge_index
    a = np.zeros((n_pad, n_pad), np.int64)
    np.add.at(a, (dst, src), 1)
    d = np.arange(num_nodes)
    a[d, d] += 1
    assert a.max() <= 127, "int8 adjacency overflow; use wider storage"
    return a.astype(np.int8)


def build_pool(batch, num_graphs, b_pad, n_pad):
    """P[g, i] = 1/|nodes in graph g| for real nodes of graph g, else 0 (f32)."""
    p = np.zeros((b_pad, n_pad), np.float32)
    for g in range(num_graphs):
        idx = np.where(batch == g)[0]
        p[g, idx] = 1.0 / max(len(idx), 1)
    return p


def build_schedule(batch, num_nodes, n_pad):
    """Flattened (row_block, col_block) schedule over the diagonal bands.

    Every row tile appears exactly once as a contiguous run; pure-padding row
    tiles get a single all-zero-adjacency step so their outputs / pool
    partials are always written (never stale VMEM / NaN).
    Requires `batch` sorted (nodes grouped per graph).
    """
    num_graphs = int(batch.max()) + 1
    g_start = np.zeros(num_graphs, np.int64)
    g_end = np.zeros(num_graphs, np.int64)
    for g in range(num_graphs):
        idx = np.where(batch == g)[0]
        g_start[g], g_end[g] = idx.min(), idx.max() + 1

    n_row_tiles = n_pad // TN
    rows, cols, firsts, lasts = [], [], [], []
    for i in range(n_row_tiles):
        lo = i * TN
        hi = min((i + 1) * TN, num_nodes)
        if lo >= num_nodes:
            blocks = [i]                       # pure padding: one dummy step
        else:
            g_lo = int(batch[lo])
            g_hi = int(batch[hi - 1])
            cb_lo = int(g_start[g_lo]) // TK
            cb_hi = (int(g_end[g_hi]) - 1) // TK
            blocks = list(range(cb_lo, cb_hi + 1))
        for k, cb in enumerate(blocks):
            rows.append(i)
            cols.append(cb)
            firsts.append(1 if k == 0 else 0)
            lasts.append(1 if k == len(blocks) - 1 else 0)
    return (np.asarray(rows, np.int32), np.asarray(cols, np.int32),
            np.asarray(firsts, np.int32), np.asarray(lasts, np.int32))


def pad2(a, rows, cols):
    out = np.zeros((rows, cols), np.float32)
    out[: a.shape[0], : a.shape[1]] = a
    return out


def init_linear(key, fan_in, fan_out):
    """PyTorch-style uniform(-1/sqrt(fan_in), ...); weight stored as (in, out)."""
    kw, kb = jax.random.split(key)
    bound = 1.0 / np.sqrt(fan_in)
    w = jax.random.uniform(kw, (fan_in, fan_out), jnp.float32, -bound, bound)
    b = jax.random.uniform(kb, (1, fan_out), jnp.float32, -bound, bound)
    return np.asarray(w), np.asarray(b)


def reference_forward(x, adj, pool, params):
    w1, b1, w2, b2, w3, b3, w4, b4 = params
    h1 = jnp.maximum(adj @ x @ w1 + b1, 0.0)
    h2 = jnp.maximum(adj @ h1 @ w2 + b2, 0.0)
    hg = pool @ h2
    return jnp.maximum(hg @ w3 + b3, 0.0) @ w4 + b4


if __name__ == "__main__":
    # Small synthetic problem: 6 ring graphs of 96 nodes (576 nodes -> padded
    # 768, i.e. 3 row tiles with 2/3/2-block bands: exercises the flattened
    # schedule, the fused pool partials, and the int8 adjacency path).
    in_channels, hidden_channels, proj_dim = 8, 32, 16
    num_graphs, nodes_per_graph = 6, 96
    num_nodes = num_graphs * nodes_per_graph             # 576

    n_pad = _round_up(max(num_nodes, TN), TN)            # 768
    b_pad = _round_up(max(num_graphs, B_PAD), B_PAD)     # 8

    key = jax.random.PRNGKey(0)
    kx, k1, k2, k3, k4 = jax.random.split(key, 5)

    x = np.asarray(jax.random.normal(kx, (num_nodes, in_channels), jnp.float32))

    # edge_index: bidirectional ring inside each graph; batch is sorted.
    src_list, dst_list = [], []
    for g in range(num_graphs):
        base = g * nodes_per_graph
        for i in range(nodes_per_graph):
            s = base + i
            d = base + (i + 1) % nodes_per_graph
            src_list += [s, d]
            dst_list += [d, s]
    edge_index = np.array([src_list, dst_list], dtype=np.int64)
    batch = np.repeat(np.arange(num_graphs), nodes_per_graph)

    # dense operators + flattened visited-block schedule
    adj_i8_np = build_adjacency_int8(edge_index, num_nodes, n_pad, eps=0.0)
    pool_np = build_pool(batch, num_graphs, b_pad, n_pad)
    sched_np = build_schedule(batch, num_nodes, n_pad)

    # parameters (f32, unpadded — shapes from the module's __init__)
    w1, b1 = init_linear(k1, in_channels, hidden_channels)       # conv1.nn
    w2, b2 = init_linear(k2, hidden_channels, hidden_channels)   # conv2.nn
    w3, b3 = init_linear(k3, hidden_channels, hidden_channels)   # proj_head[0]
    w4, b4 = init_linear(k4, hidden_channels, proj_dim)          # proj_head[2]

    # padded kernel operands: int8 adjacency, f32 pool, bf16 features/weights,
    # f32 biases.
    adj_i8 = jnp.asarray(adj_i8_np)
    pool_f32 = jnp.asarray(pool_np, jnp.float32)
    x_bf = jnp.asarray(pad2(x, n_pad, FPAD), jnp.bfloat16)
    params_pad = (
        jnp.asarray(pad2(w1, FPAD, FPAD), jnp.bfloat16),
        jnp.asarray(pad2(b1, 1, FPAD), jnp.float32),
        jnp.asarray(pad2(w2, FPAD, FPAD), jnp.bfloat16),
        jnp.asarray(pad2(b2, 1, FPAD), jnp.float32),
        jnp.asarray(pad2(w3, FPAD, FPAD), jnp.bfloat16),
        jnp.asarray(pad2(b3, 1, FPAD), jnp.float32),
        jnp.asarray(pad2(w4, FPAD, FPAD), jnp.bfloat16),
        jnp.asarray(pad2(b4, 1, FPAD), jnp.float32),
    )
    sched = tuple(jnp.asarray(s, jnp.int32) for s in sched_np)

    out_pad = gnn_forward(x_bf, adj_i8, pool_f32, params_pad, sched)
    out_pad = jax.block_until_ready(out_pad)
    z = np.asarray(out_pad)[:num_graphs, :proj_dim]

    # f32 unpadded reference (module semantics)
    params_f32 = tuple(jnp.asarray(p) for p in (w1, b1, w2, b2, w3, b3, w4, b4))
    z_ref = np.asarray(reference_forward(
        jnp.asarray(x),
        jnp.asarray(adj_i8_np[:num_nodes, :num_nodes].astype(np.float32)),
        jnp.asarray(pool_np[:num_graphs, :num_nodes]),
        params_f32))

    assert z.shape == (num_graphs, proj_dim)
    # bf16 operands/activations vs f32 reference -> loose tolerance
    np.testing.assert_allclose(z, z_ref, rtol=5e-2, atol=5e-2)

    print("KERNEL_OK")
</pallas_src>

<mosaic_0001>
module attributes {stable_mosaic.version = 11 : i64} {
  func.func @_gin_layer_kernel(%arg0: i32, %arg1: memref<7xi32, #tpu.memory_space<smem>>, %arg2: memref<7xi32, #tpu.memory_space<smem>>, %arg3: memref<7xi32, #tpu.memory_space<smem>>, %arg4: memref<7xi32, #tpu.memory_space<smem>>, %arg5: memref<256x256xi8, #tpu.memory_space<vmem>>, %arg6: memref<256x128xbf16, #tpu.memory_space<vmem>>, %arg7: memref<128x128xbf16, #tpu.memory_space<vmem>>, %arg8: memref<1x128xf32, #tpu.memory_space<vmem>>, %arg9: memref<256x128xbf16, #tpu.memory_space<vmem>>, %arg10: memref<256x128xf32, #tpu.memory_space<vmem>>) attributes {dimension_semantics = [#tpu.dimension_semantics<arbitrary>], iteration_bounds = array<i64: 7>, scalar_prefetch = 4 : i64, scratch_operands = 1 : i64, tpu.core_type = #tpu.core_type<tc>, window_params = [{transform_indices = @transform_0, window_bounds = array<i64: 256, 256>}, {transform_indices = @transform_1, window_bounds = array<i64: 256, 128>}, {pipeline_mode = #tpu.pipeline_mode<synchronous>, transform_indices = @transform_2, window_bounds = array<i64: 128, 128>}, {pipeline_mode = #tpu.pipeline_mode<synchronous>, transform_indices = @transform_3, window_bounds = array<i64: 1, 128>}, {transform_indices = @transform_4, window_bounds = array<i64: 256, 128>}]} {
    %0 = arith.index_cast %arg0 : i32 to index
    %1 = memref.load %arg3[%0] : memref<7xi32, #tpu.memory_space<smem>>
    %c1_i32 = arith.constant 1 : i32
    %2 = arith.cmpi eq, %1, %c1_i32 : i32
    %3 = arith.extui %2 : i1 to i32
    %c0_i32 = arith.constant 0 : i32
    %4 = arith.cmpi ne, %3, %c0_i32 : i32
    scf.if %4 {
      %cst_9 = arith.constant 0.000000e+00 : f32
      %19 = vector.broadcast %cst_9 : f32 to vector<256x128xf32>
      %c0_10 = arith.constant 0 : index
      %c0_11 = arith.constant 0 : index
      %20 = vector.load %arg10[%c0_10, %c0_11] : memref<256x128xf32, #tpu.memory_space<vmem>>, vector<256x128xf32>
      tpu.vector_store %arg10[%c0_10, %c0_11], %19 {strides = array<i32>} : memref<256x128xf32, #tpu.memory_space<vmem>>, vector<256x128xf32>,
    } else {
    }
    %c0 = arith.constant 0 : index
    %c0_0 = arith.constant 0 : index
    %5 = vector.load %arg10[%c0, %c0_0] : memref<256x128xf32, #tpu.memory_space<vmem>>, vector<256x128xf32>
    %c0_1 = arith.constant 0 : index
    %c0_2 = arith.constant 0 : index
    %6 = vector.load %arg5[%c0_1, %c0_2] : memref<256x256xi8, #tpu.memory_space<vmem>>, vector<256x256xi8>
    %7 = arith.extsi %6 : vector<256x256xi8> to vector<256x256xi32>
    %8 = arith.sitofp %7 : vector<256x256xi32> to vector<256x256xf32>
    %9 = arith.truncf %8 : vector<256x256xf32> to vector<256x256xbf16>
    %c0_3 = arith.constant 0 : index
    %c0_4 = arith.constant 0 : index
    %10 = vector.load %arg6[%c0_3, %c0_4] : memref<256x128xbf16, #tpu.memory_space<vmem>>, vector<256x128xbf16>
    %cst = arith.constant dense<0.000000e+00> : vector<256x128xf32>
    %11 = tpu.matmul %9, %10, %cst {dimension_numbers = #tpu.dot_dimension_numbers<[1], [0], [0], [1], [0, 0, 1, 1], [], []>} : vector<256x256xbf16>, vector<256x128xbf16>, vector<256x128xf32> -> vector<256x128xf32>
    %12 = arith.addf %5, %11 : vector<256x128xf32>
    %c0_5 = arith.constant 0 : index
    %c0_6 = arith.constant 0 : index
    %13 = vector.load %arg10[%c0_5, %c0_6] : memref<256x128xf32, #tpu.memory_space<vmem>>, vector<256x128xf32>
    tpu.vector_store %arg10[%c0_5, %c0_6], %12 {strides = array<i32>} : memref<256x128xf32, #tpu.memory_space<vmem>>, vector<256x128xf32>,
    %14 = arith.index_cast %arg0 : i32 to index
    %15 = memref.load %arg4[%14] : memref<7xi32, #tpu.memory_space<smem>>
    %c1_i32_7 = arith.constant 1 : i32
    %16 = arith.cmpi eq, %15, %c1_i32_7 : i32
    %17 = arith.extui %16 : i1 to i32
    %c0_i32_8 = arith.constant 0 : i32
    %18 = arith.cmpi ne, %17, %c0_i32_8 : i32
    scf.if %18 {
      %c0_9 = arith.constant 0 : index
      %c0_10 = arith.constant 0 : index
      %19 = vector.load %arg10[%c0_9, %c0_10] : memref<256x128xf32, #tpu.memory_space<vmem>>, vector<256x128xf32>
      %20 = arith.truncf %19 : vector<256x128xf32> to vector<256x128xbf16>
      %c0_11 = arith.constant 0 : index
      %c0_12 = arith.constant 0 : index
      %21 = vector.load %arg7[%c0_11, %c0_12] : memref<128x128xbf16, #tpu.memory_space<vmem>>, vector<128x128xbf16>
      %cst_13 = arith.constant dense<0.000000e+00> : vector<256x128xf32>
      %22 = tpu.matmul %20, %21, %cst_13 {dimension_numbers = #tpu.dot_dimension_numbers<[1], [0], [0], [1], [0, 0, 1, 1], [], []>} : vector<256x128xbf16>, vector<128x128xbf16>, vector<256x128xf32> -> vector<256x128xf32>
      %c0_14 = arith.constant 0 : index
      %c0_15 = arith.constant 0 : index
      %23 = vector.load %arg8[%c0_14, %c0_15] : memref<1x128xf32, #tpu.memory_space<vmem>>, vector<1x128xf32>
      %24 = vector.broadcast %23 : vector<1x128xf32> to vector<256x128xf32>
      %25 = arith.addf %22, %24 : vector<256x128xf32>
      %cst_16 = arith.constant 0.000000e+00 : f32
      %26 = vector.broadcast %cst_16 : f32 to vector<256x128xf32>
      %27 = arith.maximumf %25, %26 : vector<256x128xf32>
      %28 = arith.truncf %27 : vector<256x128xf32> to vector<256x128xbf16>
      %c0_17 = arith.constant 0 : index
      %c0_18 = arith.constant 0 : index
      %29 = vector.load %arg9[%c0_17, %c0_18] : memref<256x128xbf16, #tpu.memory_space<vmem>>, vector<256x128xbf16>
      tpu.vector_store %arg9[%c0_17, %c0_18], %28 {strides = array<i32>} : memref<256x128xbf16, #tpu.memory_space<vmem>>, vector<256x128xbf16>,
    } else {
    }
    return
  }
  func.func @transform_0(%arg0: i32, %arg1: memref<7xi32, #tpu.memory_space<smem>>, %arg2: memref<7xi32, #tpu.memory_space<smem>>, %arg3: memref<7xi32, #tpu.memory_space<smem>>, %arg4: memref<7xi32, #tpu.memory_space<smem>>) -> (i32, i32) {
    %0 = arith.index_cast %arg0 : i32 to index
    %1 = memref.load %arg1[%0] : memref<7xi32, #tpu.memory_space<smem>>
    %2 = arith.index_cast %arg0 : i32 to index
    %3 = memref.load %arg2[%2] : memref<7xi32, #tpu.memory_space<smem>>
    %c0_i32 = arith.constant 0 : i32
    return %1, %3 : i32, i32
  }
  func.func @transform_1(%arg0: i32, %arg1: memref<7xi32, #tpu.memory_space<smem>>, %arg2: memref<7xi32, #tpu.memory_space<smem>>, %arg3: memref<7xi32, #tpu.memory_space<smem>>, %arg4: memref<7xi32, #tpu.memory_space<smem>>) -> (i32, i32) {
    %0 = arith.index_cast %arg0 : i32 to index
    %1 = memref.load %arg2[%0] : memref<7xi32, #tpu.memory_space<smem>>
    %c0_i32 = arith.constant 0 : i32
    %c0_i32_0 = arith.constant 0 : i32
    return %1, %c0_i32 : i32, i32
  }
  func.func @transform_2(%arg0: i32, %arg1: memref<7xi32, #tpu.memory_space<smem>>, %arg2: memref<7xi32, #tpu.memory_space<smem>>, %arg3: memref<7xi32, #tpu.memory_space<smem>>, %arg4: memref<7xi32, #tpu.memory_space<smem>>) -> (i32, i32) {
    %c0_i32 = arith.constant 0 : i32
    %c0_i32_0 = arith.constant 0 : i32
    %c0_i32_1 = arith.constant 0 : i32
    return %c0_i32, %c0_i32_0 : i32, i32
  }
  func.func @transform_3(%arg0: i32, %arg1: memref<7xi32, #tpu.memory_space<smem>>, %arg2: memref<7xi32, #tpu.memory_space<smem>>, %arg3: memref<7xi32, #tpu.memory_space<smem>>, %arg4: memref<7xi32, #tpu.memory_space<smem>>) -> (i32, i32) {
    %c0_i32 = arith.constant 0 : i32
    %c0_i32_0 = arith.constant 0 : i32
    %c0_i32_1 = arith.constant 0 : i32
    return %c0_i32, %c0_i32_0 : i32, i32
  }
  func.func @transform_4(%arg0: i32, %arg1: memref<7xi32, #tpu.memory_space<smem>>, %arg2: memref<7xi32, #tpu.memory_space<smem>>, %arg3: memref<7xi32, #tpu.memory_space<smem>>, %arg4: memref<7xi32, #tpu.memory_space<smem>>) -> (i32, i32) {
    %0 = arith.index_cast %arg0 : i32 to index
    %1 = memref.load %arg1[%0] : memref<7xi32, #tpu.memory_space<smem>>
    %c0_i32 = arith.constant 0 : i32
    %c0_i32_0 = arith.constant 0 : i32
    return %1, %c0_i32 : i32, i32
  }
}

</mosaic_0001>

<bundles_post_ra>
// kernel: tpu_custom_call.1
= control target key start
LH: loop header
LB: loop body
LE: loop exit
PB: predicated region body
PF: predicated region fallthrough
CT: control target
= control target key end

     0   :  { %s2784_s0 = inlined_call_operand.hbm [shape: s32[7], index: 0, kind: input, shape index: {}]   ;;  %s2785_s4 = inlined_call_operand.hbm [shape: s8[768,768], index: 4, kind: input, shape index: {}]   ;;  %s2786_s5 = inlined_call_operand.hbm [shape: bf16[768,128], index: 5, kind: input, shape index: {}]   ;;  %s2787_s6 = inlined_call_operand.hbm [shape: bf16[128,128], index: 6, kind: input, shape index: {}]   ;;  %s2788_s7 = inlined_call_operand.vmem [shape: f32[1,128], index: 7, kind: input, shape index: {}]   ;;  %s2789_s8 = inlined_call_operand.hbm [shape: bf16[768,128], index: 8, kind: output, shape index: {}]   ;;  %s2790_s1 = inlined_call_operand.vmem [shape: s32[7], index: 1, kind: input, shape index: {}]   ;;  %s2791_s2 = inlined_call_operand.vmem [shape: s32[7], index: 2, kind: input, shape index: {}]   ;;  %s2792_s3 = inlined_call_operand.vmem [shape: s32[7], index: 3, kind: input, shape index: {}]  }
   0x1   :  { %2809 = sst [smem:[#allocation33_spill]] %s2787_s6  ;;  %s1972_s29 = scalar_lea.hbm %s2784_s0, 16 }
   0x2   :  { %2810 = sst [smem:[#allocation34_spill]] %s2789_s8  ;;  %p1973_p0 = scmp.ne.s32.totalorder %s2784_s0, %s1972_s29 }
   0x3   :  { %p1976_p1 = scmp.lt.u32.totalorder %s1972_s29, %s2784_s0 }
   0x5   :  { %p1978_p2 = pnand %p1976_p1, %p1973_p0 }
   0x7   :  { %1981 = shalt.err (!%p1978_p2)  }
   0x8   :  { %s2232_s12 = smov [#allocation4]   ;;  %s15_s17 = sshll.u32 %s2790_s1, 4  ;;  %s16_s17 = int_to_ptr.vmem [resolvable:$true] %s15_s17 }
   0x9   :  { %14 = dma.hbm_to_smem %s2784_s0, 16, %s2232_s12, [#allocation3] }
   0xa   :  { %s19_s20 = sshll.u32 %s2791_s2, 4  ;;  %s1982_s21 = scalar_lea.vmem %s16_s17, 16  ;;  %s20_s20 = int_to_ptr.vmem [resolvable:$true] %s19_s20 }
   0xb   :  { %p1983_p3 = scmp.ne.s32.totalorder %s16_s17, %s1982_s21  ;;  %p1987_p4 = scmp.lt.s32.totalorder %s16_s17, %s16_s17 }
   0xc   :  { %p1988_p5 = scmp.lt.s32.totalorder %s1982_s21, %s1982_s21 }
   0xe   :  { %p1989_p6 = por %p1988_p5, %p1987_p4 }
  0x10   :  { %p1990_p7 = pnand %p1989_p6, %p1983_p3 }
  0x12   :  { %1993 = shalt.err (!%p1990_p7)  }
  0x13   :  { %s2233_s22 = smov [#allocation5]   ;;  %s23_s24 = sshll.u32 %s2792_s3, 4  ;;  %s24_s24 = int_to_ptr.vmem [resolvable:$true] %s23_s24 }
  0x14   :  { %18 = dma.vmem_to_smem %s16_s17, 16, %s2233_s22, [#allocation3] }
  0x15   :  { %s1994_s1 = scalar_lea.vmem %s20_s20, 16  ;;  %p1999_p9 = scmp.lt.s32.totalorder %s20_s20, %s20_s20 }
  0x16   :  { %p1995_p8 = scmp.ne.s32.totalorder %s20_s20, %s1994_s1  ;;  %p2000_p10 = scmp.lt.s32.totalorder %s1994_s1, %s1994_s1 }
  0x18   :  { %p2001_p11 = por %p2000_p10, %p1999_p9 }
  0x1a   :  { %p2002_p12 = pnand %p2001_p11, %p1995_p8 }
  0x1c   :  { %2005 = shalt.err (!%p2002_p12)  }
  0x1d   :  { %s2234_s2 = smov [#allocation6]   ;;  %s2006_s25 = scalar_lea.vmem %s24_s24, 16 }
  0x1e   :  { %22 = dma.vmem_to_smem %s20_s20, 16, %s2234_s2, [#allocation3] }
  0x1f   :  { %p2007_p13 = scmp.ne.s32.totalorder %s24_s24, %s2006_s25  ;;  %p2011_p0 = scmp.lt.s32.totalorder %s24_s24, %s24_s24 }
  0x20   :  { %p2012_p1 = scmp.lt.s32.totalorder %s2006_s25, %s2006_s25 }
  0x22   :  { %p2013_p2 = por %p2012_p1, %p2011_p0 }
  0x24   :  { %p2014_p3 = pnand %p2013_p2, %p2007_p13 }
  0x26   :  { %2017 = shalt.err (!%p2014_p3)  }
  0x27   :  { %s2235_s26 = smov [#allocation7]  }
  0x28   :  { %26 = dma.vmem_to_smem %s24_s24, 16, %s2235_s26, [#allocation3] }
  0x29   :  { %2174 = dma.done.wait [#allocation3], 64 }
  0x2a   :  { %2175 = vsyncadd [#allocation3], 4294967232 }
  0x2b   :  { %28 = sfence }
  0x2c   :  { %29 = vsyncpa [#allocation9], 0 }
  0x2d   :  { %31 = vsyncpa [#allocation9 + $0x1], 0 }
  0x2e   :  { %32 = vsyncpa [#allocation12], 0 }
  0x2f   :  { %34 = vsyncpa [#allocation12 + $0x1], 0 }
  0x30   :  { %35 = vsyncpa [#allocation10], 0 }
  0x31   :  { %37 = vsyncpa [#allocation10 + $0x1], 0  ;;  %s2314_s3 = smov 0   ;;  %s2316_s27 = smov 0  }
  0x32   :  { %s2318_s28 = smov 0   ;;  %s2320_s29 = smov 0  }
  0x33   :  { %s2322_s30 = smov 0   ;;  %s2324_s9 = smov 0  }
  0x34   :  { %s2326_s10 = smov 0   ;;  %s2328_s11 = smov 0  }
  0x35   :  { %s2330_s12 = smov 0   ;;  %s2332_s13 = smov 0  }
  0x36 LB: > { %2811 = sst [smem:[#allocation27_spill]] %s2194_s3  ;;  %s2361_s14 = sadd.s32 4294967295, %s2230_s13   ;;  %s2230_s13 = sphi %s2332_s13, %s2846_s13   ;;  %s2226_s12 = sphi %s2330_s12, %s2858_s12   ;;  %s2222_s11 = sphi %s2328_s11, %s2857_s11   ;;  %s2218_s10 = sphi %s2326_s10, %s2856_s10   ;;  %s2214_s9 = sphi %s2324_s9, %s2855_s9   ;;  %s2210_s30 = sphi %s2322_s30, %s2854_s30   ;;  %s2206_s29 = sphi %s2320_s29, %s2853_s29   ;;  %s2202_s28 = sphi %s2318_s28, %s2848_s28   ;;  %s2198_s27 = sphi %s2316_s27, %s2852_s27   ;;  %s2194_s3 = sphi %s2314_s3, %s2851_s3  }
  0x37   : > { %2812 = sst [smem:[#allocation28_spill]] %s2202_s28  ;;  %s1385_s15 = sadd.s32 4294967294, %s2230_s13  }
  0x38   : > { %s2365_s16 = sadd.s32 1, %s2230_s13   ;;  %p69_p4 = scmp.ne.s32.totalorder %s2222_s11, %s2218_s10 }
  0x39   : > { %2813 = sst [smem:[#allocation29_spill]] %s2365_s16  ;;  %p2793_p5 = scmp.eq.s32.totalorder %s2361_s14, 0 }
  0x3a   : > { %p97_p6 = scmp.ne.s32.totalorder %s2210_s30, %s2206_s29  ;;  %s149_s17 = sld [smem:[#allocation4 + %s2230_s13]] }
  0x3b   : > { %s150_s18 = sld [smem:[#allocation4 + %s2365_s16]]  ;;  %p2374_p7 = por %p2793_p5, %p69_p4 }
  0x3c   : > { %p2380_p8 = por %p97_p6, %p2793_p5  ;;  %s154_s21 = sadd.s32 1, %s2202_s28 }
  0x3d   : > { %s2814_s19 = scalar_select %p2374_p7, 1, 0 }
  0x3e   : > { %s2815_s20 = scalar_select %p2380_p8, 1, 0 }
  0x3f   : > { %p164_p9 = scmp.ne.s32.totalorder %s2202_s28, %s2198_s27  ;;  %p165_p10 = scmp.eq.s32.totalorder %s2361_s14, 6 }
  0x40   : > { %p170_p11 = scmp.ne.s32.totalorder %s2198_s27, %s2194_s3  ;;  %p171_p12 = scmp.eq.s32.totalorder %s1385_s15, 6 }
  0x41   : > { %p1386_p13 = scmp.ge.s32.totalorder %s2230_s13, 1  ;;  %p2391_p0 = por %p165_p10, %p164_p9 }
  0x42   : > { %p178_p1 = scmp.lt.s32.totalorder %s2230_s13, 8  ;;  %s151_s0 = ssub.s32 %s149_s17, %s150_s18 }
  0x43   : > { %s2816_s22 = scalar_select %p2391_p0, 1, 0 }
  0x44   : > { %p2396_p2 = por %p171_p12, %p170_p11  ;;  %p152_p3 = scmp.eq.s32.totalorder %s151_s0, 0 }
  0x45   : > { %p2400_p4 = pnand %p1386_p13, %p178_p1  ;;  %s2236_s2 = smov [#allocation13]  }
  0x46   : > { %s2817_s23 = scalar_select %p2396_p2, 1, 0 }
  0x47   : > { %s2819_s24 = scalar_select %p2400_p4, 1, 0 }
  0x48   : > { %2818 = sst [smem:[#allocation30_spill]] %s2817_s23  ;;  %p1830_p6 = pneg %p2400_p4 }
  0x49   : > { %s2405_s1 = scalar_select %p152_p3, %s2202_s28, %s154_s21  }
  0x4a   : > { %s190_s25 = sshll.u32 %s2236_s2, 4  ;;  %p2411_p9 = pnand %p1830_p6, %p2793_p5  ;;  %s191_s25 = int_to_ptr.vmem [resolvable:$true] %s190_s25 }
  0x4b   : > { %2820 = sst [smem:[#allocation31_spill]] %s2405_s1  ;;  %s2822_s6 = sld [smem:[#allocation33_spill]] }
  0x4c   : > { %p2020_p11 = pneg %p2411_p9 }
  0x51   : > { %s2018_s15 = scalar_lea.hbm %s2822_s6, 1024 }
  0x52   : > { %p2019_p10 = scmp.ne.s32.totalorder %s2822_s6, %s2018_s15  ;;  %p2025_p1 = scmp.lt.u32.totalorder %s2018_s15, %s2822_s6 }
  0x54   : > { %p2021_p12 = pnand %p2020_p11, %p2019_p10 }
  0x56   : > { %p2022_p13 = pneg %p2021_p12 }
  0x58   : > { %p2027_p3 = pnand %p2025_p1, %p2022_p13 }
  0x5a   : > { %2030 = shalt.err (!%p2027_p3)
}
  0x5b   : > { %s2031_s2 = scalar_lea.vmem %s191_s25, 1024  ;;  %p2039_p0 = scmp.lt.s32.totalorder %s191_s25, %s191_s25 }
  0x5c   : > { %p2032_p6 = scmp.ne.s32.totalorder %s191_s25, %s2031_s2  ;;  %p2040_p8 = scmp.lt.s32.totalorder %s2031_s2, %s2031_s2 }
  0x5e   : > { %p2034_p5 = pnand %p2032_p6, %p2020_p11  ;;  %p2041_p7 = por %p2040_p8, %p2039_p0 }
  0x60   : > { %p2035_p2 = pneg %p2034_p5 }
  0x62   : > { %p2042_p4 = pnand %p2041_p7, %p2035_p2 }
  0x64   : > { %2045 = shalt.err (!%p2042_p4)
}
  0x65   : > { %s2799_s29 = smov 64   ;;  %s2800_s10 = smov 4  }
  0x66   : > { %1833 = dma.hbm_to_vmem [thread:$0]  (!%p2411_p9), %s2822_s6, 1024, %s191_s25, [#allocation12], %s2799_s29, %s2799_s29, %s2800_s10  }
  0x67   : > { %s47_s18 = sld [smem:[#allocation4 + %s2230_s13]]  ;;  %p63_p5 = scmp.ne.s32.totalorder %s2226_s12, %s2222_s11 }
  0x68   : > { %s48_s21 = sld [smem:[#allocation5 + %s2230_s13]]  ;;  %p64_p7 = scmp.eq.s32.totalorder %s2230_s13, 0 }
  0x69   : > { %s49_s0 = sld [smem:[#allocation4 + %s2365_s16]]  ;;  %s2802_s1 = sand.u32 1, %s2226_s12  }
  0x6a   : > { %s50_s2 = sld [smem:[#allocation5 + %s2365_s16]]  ;;  %s56_s26 = sadd.s32 1, %s2226_s12 }
  0x6b   : > { %p2807_p8 = scmp.lt.s32.totalorder %s2230_s13, 7  ;;  %p2446_p0 = por %p64_p7, %p63_p5 }
  0x6c   : > { %s1389_s25 = sshll.u32 %s2802_s1, 7  ;;  %p91_p9 = scmp.ne.s32.totalorder %s2214_s9, %s2210_s30 }
  0x6d   : > { %s1814_s10 = scalar_select %p2446_p0, [#allocation4], [#allocation15] }
  0x6e   : > { %s1815_s23 = scalar_select %p2446_p0, %s2230_s13, 0 }
  0x6f   : > { %s51_s15 = ssub.s32 %s47_s18, %s49_s0  ;;  %s2860_s10 = smov (!%p2807_p8, %s1814_s10), [#allocation19] }
  0x70   : > { %s52_s17 = ssub.s32 %s48_s21, %s50_s2  ;;  %s2862_s23 = smov (!%p2807_p8, %s1815_s23), 0 }
  0x71   : > { %s53_s29 = sor.u32 %s52_s17, %s51_s15  ;;  %s212_s21 = sld [smem:[%s2860_s10 + %s2862_s23]] }
  0x72   : > { %p54_p2 = scmp.eq.s32.totalorder %s53_s29, 0  ;;  %s211_s29 = scalar_lea.vmem [#allocation8], %s1389_s25 }
  0x73   : > { %s1816_s18 = scalar_select %p2446_p0, [#allocation5], [#allocation16] }
  0x74   : > { %s2455_s6 = scalar_select %p54_p2, %s2226_s12, %s56_s26  }
  0x75   : > { %s2864_s18 = smov (!%p2807_p8, %s1816_s18), [#allocation20]  ;;  %s223_s0 = sshll.u32 %s211_s29, 4  ;;  %s2478_s0 = int_to_ptr.vmem [resolvable:$true] %s223_s0 }
  0x76   : > { %2824 = sst [smem:[#allocation32_spill]] %s2455_s6  ;;  %p2472_p4 = pnand %p2807_p8, %p2446_p0 }
  0x77   : > { %s213_s26 = sld [smem:[%s2864_s18 + %s2862_s23]]  ;;  %s1811_s1 = smul.u32 48, %s212_s21 }
  0x78   : > { %s79_s15 = sld [smem:[#allocation5 + %s2230_s13]]  ;;  %s84_s10 = sadd.s32 1, %s2214_s9 }
  0x79   : > { %s80_s17 = sld [smem:[#allocation5 + %s2365_s16]]  ;;  %s235_s25 = sand.u32 1, %s2214_s9  }
  0x7a   : > { %p2486_p10 = por %p91_p9, %p64_p7  ;;  %p2048_p13 = pneg %p2472_p4 }
  0x7c   : > { %s2826_s28 = scalar_select %p2486_p10, 1, 0 }
  0x7d   : > { %s1391_s6 = sshll.u32 %s213_s26, 1 }
  0x7e   : > { %s220_s29 = sadd.s32 %s1811_s1, %s1391_s6  ;;  %s2828_s6 = sand.u32 1, %s2226_s12  }
  0x7f   : > { %s1393_s3 = sshll.u32 %s220_s29, 7  ;;  %s81_s8 = ssub.s32 %s79_s15, %s80_s17 }
  0x80   : > { %s2493_s16 = scalar_lea.hbm %s2785_s4, %s1393_s3  ;;  %p2495_p11 = scmp.eq.s32.totalorder %s81_s8, 0 }
  0x81   : > { %s2501_s1 = scalar_lea.sflag [#allocation9], %s2828_s6  ;;  %s2046_s26 = scalar_lea.hbm %s2493_s16, 2048 }
  0x82   : > { %p2047_p12 = scmp.ne.s32.totalorder %s2493_s16, %s2046_s26  ;;  %s2051_s17 = scalar_lea.hbm %s2785_s4, 18432 }
  0x83   : > { %p2052_p6 = scmp.lt.u32.totalorder %s2493_s16, %s2785_s4  ;;  %p2053_p5 = scmp.lt.u32.totalorder %s2051_s17, %s2046_s26 }
  0x84   : > { %p2049_p1 = pnand %p2048_p13, %p2047_p12  ;;  %p2055_p0 = scmp.lt.u32.totalorder %s2046_s26, %s2493_s16 }
  0x85   : > { %p2054_p7 = por %p2053_p5, %p2052_p6 }
  0x86   : > { %p2050_p3 = pneg %p2049_p1 }
  0x87   : > { %p2056_p2 = por %p2055_p0, %p2054_p7 }
  0x89   : > { %p2057_p9 = pnand %p2056_p2, %p2050_p3 }
  0x8b   : > { %2060 = shalt.err (!%p2057_p9)
}
  0x8c   : > { %s2061_s23 = scalar_lea.vmem %s2478_s0, 2048  ;;  %s2239_s18 = smov [#allocation8]  }
  0x8d   : > { %p2062_p12 = scmp.ne.s32.totalorder %s2478_s0, %s2061_s23  ;;  %s2066_s6 = sshll.u32 %s2239_s18, 4  ;;  %s2067_s6 = int_to_ptr.vmem [resolvable:$false] %s2066_s6 }
  0x8e   : > { %s2068_s3 = scalar_lea.vmem %s2067_s6, 4096  ;;  %p2069_p10 = scmp.lt.s32.totalorder %s2478_s0, %s2067_s6 }
  0x8f   : > { %p2064_p1 = pnand %p2062_p12, %p2048_p13  ;;  %p2070_p6 = scmp.lt.s32.totalorder %s2068_s3, %s2061_s23 }
  0x91   : > { %p2065_p8 = pneg %p2064_p1  ;;  %p2071_p5 = por %p2070_p6, %p2069_p10 }
  0x93   : > { %p2072_p7 = pnand %p2071_p5, %p2065_p8 }
  0x95   : > { %2075 = shalt.err (!%p2072_p7)
}
  0x96   : > { %s2240_s26 = smov 768   ;;  %s2241_s15 = smov 256  }
  0x97   : > { %s2242_s17 = smov 16   ;;  %s1394_s8 = sshll.u32 %s235_s25, 7 }
  0x98   : > { %1841 = dma.hbm_to_vmem [thread:$0]  (!%p2472_p4), %s2493_s16, 2048, %s2478_s0, %s2501_s1, %s2240_s26, %s2241_s15, %s2242_s17  }
  0x99   : > { %s2534_s29 = scalar_select %p2495_p11, %s2214_s9, %s84_s10  }
  0x9a   : > { %p2829_p8 = scmp.ne.s32.totalorder %s2826_s28, 0  ;;  %p2830_p10 = scmp.lt.s32.totalorder %s2230_s13, 7 }
  0x9b   : > { %s233_s0 = sand.u32 1, %s2230_s13   ;;  %s237_s2 = scalar_lea.vmem [#allocation11], %s1394_s8 }
  0x9c   : > { %p2542_p13 = pnand %p2830_p10, %p2829_p8  ;;  %p2832_p3 = pmov %p2830_p10 }
  0x9d   : > { %s1819_s18 = scalar_select %p2829_p8, [#allocation5], [#allocation17] }
  0x9e   : > { %s1820_s6 = scalar_select %p2829_p8, %s2230_s13, 0 }
  0x9f   : > { %s2866_s18 = smov (!%p2832_p3, %s1819_s18), [#allocation21]  ;;  %p2833_p4 = pmov %p2832_p3 }
  0xa0   : > { %s245_s10 = sshll.u32 %s237_s2, 4  ;;  %s2563_s28 = scalar_lea.sflag [#allocation12], %s233_s0  ;;  %s2556_s10 = int_to_ptr.vmem [resolvable:$true] %s245_s10 }
  0xa1   : > { %s2868_s6 = smov (!%p2833_p4, %s1820_s6), 0  ;;  %p2078_p0 = pneg %p2542_p13 }
  0xa2   : > { %s238_s16 = sld [smem:[%s2866_s18 + %s2868_s6]]  ;;  %s2081_s8 = scalar_lea.hbm %s2786_s5, 6144 }
  0xa8   : > { %s1466_s25 = sshll.u32 %s238_s16, 11 }
  0xa9   : > { %s2561_s3 = scalar_lea.hbm %s2786_s5, %s1466_s25 }
  0xaa   : > { %s2076_s26 = scalar_lea.hbm %s2561_s3, 2048  ;;  %p2082_p12 = scmp.lt.u32.totalorder %s2561_s3, %s2786_s5 }
  0xab   : > { %p2077_p11 = scmp.ne.s32.totalorder %s2561_s3, %s2076_s26  ;;  %p2083_p1 = scmp.lt.u32.totalorder %s2081_s8, %s2076_s26 }
  0xac   : > { %p2085_p5 = scmp.lt.u32.totalorder %s2076_s26, %s2561_s3 }
  0xad   : > { %p2079_p2 = pnand %p2078_p0, %p2077_p11  ;;  %p2084_p6 = por %p2083_p1, %p2082_p12 }
  0xaf   : > { %p2080_p9 = pneg %p2079_p2  ;;  %p2086_p7 = por %p2085_p5, %p2084_p6 }
  0xb1   : > { %p2087_p8 = pnand %p2086_p7, %p2080_p9 }
  0xb3   : > { %2090 = shalt.err (!%p2087_p8)
}
  0xb4   : > { %s2091_s16 = scalar_lea.vmem %s2556_s10, 2048  ;;  %s2243_s0 = smov [#allocation11]  }
  0xb5   : > { %p2092_p10 = scmp.ne.s32.totalorder %s2556_s10, %s2091_s16  ;;  %s2096_s2 = sshll.u32 %s2243_s0, 4  ;;  %s2097_s2 = int_to_ptr.vmem [resolvable:$false] %s2096_s2 }
  0xb6   : > { %s2098_s25 = scalar_lea.vmem %s2097_s2, 4096  ;;  %p2099_p11 = scmp.lt.s32.totalorder %s2556_s10, %s2097_s2 }
  0xb7   : > { %p2094_p3 = pnand %p2092_p10, %p2078_p0  ;;  %p2100_p2 = scmp.lt.s32.totalorder %s2098_s25, %s2091_s16 }
  0xb9   : > { %p2095_p4 = pneg %p2094_p3  ;;  %p2101_p12 = por %p2100_p2, %p2099_p11 }
  0xbb   : > { %p2102_p1 = pnand %p2101_p12, %p2095_p4 }
  0xbd   : > { %2105 = shalt.err (!%p2102_p1)
}
  0xbe   : > { %s2834_s21 = smov 4   ;;  %s2835_s1 = smov 64  }
  0xbf   : > { %1846 = dma.hbm_to_vmem [thread:$0]  (!%p2542_p13), %s2561_s3, 2048, %s2556_s10, %s2563_s28, %s2835_s1, %s2835_s1, %s2834_s21  }
  0xc0   : > { %p2836_p0 = scmp.ne.s32.totalorder %s2819_s24, 0 }
  0xc1   : > { %s259_s26 = sand.u32 (!%p2836_p0), 1, %s2222_s11   ;;  %p2837_p9 = scmp.ne.s32.totalorder (!%p2836_p0), %s2814_s19, 0 }
  0xc2   : > { %257 = sbr.rel (%p2836_p0) target bundleno = 824 (0x338), region = 36  ;;  %s1398_s15 = sshll.u32 (!%p2836_p0), %s259_s26, 7 }
  0xc3   : > { %s260_s17 = scalar_lea.sflag (!%p2836_p0), [#allocation9], %s259_s26  ;;  %s2597_s8 = scalar_lea.vmem (!%p2836_p0), [#allocation8], %s1398_s15 }
  0xc9   : > { %2177 = dma.done.wait (%p2837_p9), %s260_s17, 2048  }
  0xca   : > { %2179 = vsyncadd (%p2837_p9), %s260_s17, 4294965248  ;;  %s268_s23 = sand.u32 1, %s2361_s14   ;;  %s270_s10 = sand.u32 1, %s2210_s30  }
  0xcb   : > { %s1399_s3 = sshll.u32 %s270_s10, 7  ;;  %s269_s24 = scalar_lea.sflag [#allocation12], %s268_s23 }
  0xcc   : > { %s2605_s28 = scalar_lea.vmem [#allocation11], %s1399_s3  ;;  %p2838_p13 = scmp.ne.s32.totalorder %s2815_s20, 0 }
  0xce   : > { %2181 = dma.done.wait (%p2838_p13), %s269_s24, 2048  }
  0xcf   : > { %2183 = vsyncadd (%p2838_p13), %s269_s24, 4294965248  ;;  %p2839_p6 = scmp.eq.s32.totalorder %s2361_s14, 0 }
  0xd1   : > { %2185 = dma.done.wait (%p2839_p6), [#allocation12], 1024   ;;  %p2840_p5 = pmov %p2839_p6 }
  0xd2   : > { %s303_s19 = sand.u32 1, %s2198_s27   ;;  %s315_s18 = sld [smem:[#allocation6 + %s2361_s14]] }
  0xd3   : > { %2187 = vsyncadd (%p2840_p5), [#allocation12], 4294966272  ;;  %s1401_s6 = sshll.u32 %s303_s19, 7 }
  0xd4   : > { %s2619_s16 = scalar_lea.vmem [#allocation14], %s1401_s6 }
  0xd8   : > { %p1402_p7 = scmp.ne.s32.totalorder %s315_s18, 1 }
  0xd9   : > { %v2244_v0 = vmov (!%p1402_p7), 0.0  }
  0xda   : > { %319 = sbr.rel (%p1402_p7) target bundleno = 234 (0xea), region = 52  ;;  %320 = vst [vmem:[#allocation2] sm:$0xff] (!%p1402_p7), %v2244_v0  ;;  %321 = vst [vmem:[#allocation2 + $0x8] sm:$0xff] (!%p1402_p7), %v2244_v0 }
  0xdb   : > { %322 = vst [vmem:[#allocation2 + $0x10] sm:$0xff] (!%p1402_p7), %v2244_v0  ;;  %323 = vst [vmem:[#allocation2 + $0x18] sm:$0xff] (!%p1402_p7), %v2244_v0 }
  0xdc   : > { %324 = vst [vmem:[#allocation2 + $0x20] sm:$0xff] (!%p1402_p7), %v2244_v0  ;;  %325 = vst [vmem:[#allocation2 + $0x28] sm:$0xff] (!%p1402_p7), %v2244_v0 }
  0xdd   : > { %326 = vst [vmem:[#allocation2 + $0x30] sm:$0xff] (!%p1402_p7), %v2244_v0  ;;  %327 = vst [vmem:[#allocation2 + $0x38] sm:$0xff] (!%p1402_p7), %v2244_v0 }
  0xde   : > { %328 = vst [vmem:[#allocation2 + $0x40] sm:$0xff] (!%p1402_p7), %v2244_v0  ;;  %329 = vst [vmem:[#allocation2 + $0x48] sm:$0xff] (!%p1402_p7), %v2244_v0 }
  0xdf   : > { %330 = vst [vmem:[#allocation2 + $0x50] sm:$0xff] (!%p1402_p7), %v2244_v0  ;;  %331 = vst [vmem:[#allocation2 + $0x58] sm:$0xff] (!%p1402_p7), %v2244_v0 }
  0xe0   : > { %332 = vst [vmem:[#allocation2 + $0x60] sm:$0xff] (!%p1402_p7), %v2244_v0  ;;  %333 = vst [vmem:[#allocation2 + $0x68] sm:$0xff] (!%p1402_p7), %v2244_v0 }
  0xe1   : > { %334 = vst [vmem:[#allocation2 + $0x70] sm:$0xff] %v2244_v0  ;;  %335 = vst [vmem:[#allocation2 + $0x78] sm:$0xff] %v2244_v0 }
  0xe2   : > { %336 = vst [vmem:[#allocation2 + $0x80] sm:$0xff] %v2244_v0  ;;  %337 = vst [vmem:[#allocation2 + $0x88] sm:$0xff] %v2244_v0 }
  0xe3   : > { %338 = vst [vmem:[#allocation2 + $0x90] sm:$0xff] %v2244_v0  ;;  %339 = vst [vmem:[#allocation2 + $0x98] sm:$0xff] %v2244_v0 }
  0xe4   : > { %340 = vst [vmem:[#allocation2 + $0xa0] sm:$0xff] %v2244_v0  ;;  %341 = vst [vmem:[#allocation2 + $0xa8] sm:$0xff] %v2244_v0 }
  0xe5   : > { %342 = vst [vmem:[#allocation2 + $0xb0] sm:$0xff] %v2244_v0  ;;  %343 = vst [vmem:[#allocation2 + $0xb8] sm:$0xff] %v2244_v0 }
  0xe6   : > { %344 = vst [vmem:[#allocation2 + $0xc0] sm:$0xff] %v2244_v0  ;;  %345 = vst [vmem:[#allocation2 + $0xc8] sm:$0xff] %v2244_v0 }
  0xe7   : > { %346 = vst [vmem:[#allocation2 + $0xd0] sm:$0xff] %v2244_v0  ;;  %347 = vst [vmem:[#allocation2 + $0xd8] sm:$0xff] %v2244_v0 }
  0xe8   : > { %348 = vst [vmem:[#allocation2 + $0xe0] sm:$0xff] %v2244_v0  ;;  %349 = vst [vmem:[#allocation2 + $0xe8] sm:$0xff] %v2244_v0 }
  0xe9   : > { %350 = vst [vmem:[#allocation2 + $0xf0] sm:$0xff] %v2244_v0  ;;  %351 = vst [vmem:[#allocation2 + $0xf8] sm:$0xff] %v2244_v0 }
  0xea PF: > { %v1948_v1 = vld [vmem:[%s2605_s28 + $0x40] sm:$0xff]   ;;  %v1950_v3 = vld [vmem:[%s2605_s28 + $0x48] sm:$0xff]   ;;  %v1952_v5 = vld [vmem:[%s2605_s28 + $0x50] sm:$0xff]   ;;  %s2654_s20 = sld [smem:[#allocation7 + %s2361_s14]] }
  0xeb   : > { %v1949_v2 = vld [vmem:[%s2605_s28] sm:$0xff]   ;;  %1595 = vmatprep.subr.bf16.mxu0 %v1948_v1  ;;  %1779 = vmatprep.subr.bf16.mxu1 %v1948_v1  ;;  %v1951_v4 = vld [vmem:[%s2605_s28 + $0x8] sm:$0xff]   ;;  %v1953_v6 = vld [vmem:[%s2605_s28 + $0x10] sm:$0xff]  }
  0xec   : > { %1596 = vmatpush3.bf16.msra.mxu0 %v1949_v2  ;;  %1787 = vmatpush3.bf16.msra.mxu1 %v1949_v2  ;;  %v1954_v7 = vld [vmem:[%s2605_s28 + $0x58] sm:$0xff]   ;;  %v1956_v9 = vld [vmem:[%s2605_s28 + $0x60] sm:$0xff]   ;;  %v1958_v11 = vld [vmem:[%s2605_s28 + $0x68] sm:$0xff]  }
  0xed   : > { %1597 = vmatprep.subr.bf16.mxu0 %v1950_v3  ;;  %1780 = vmatprep.subr.bf16.mxu1 %v1950_v3  ;;  %v1955_v8 = vld [vmem:[%s2605_s28 + $0x18] sm:$0xff]   ;;  %v1957_v10 = vld [vmem:[%s2605_s28 + $0x20] sm:$0xff]   ;;  %v385_v12 = vld [vmem:[%s2597_s8 + $0x8] sm:$0xff] }
  0xee   : > { %v393_v13 = vld [vmem:[%s2597_s8 + $0x48] sm:$0xff]  ;;  %v401_v14 = vunpack.c.l.s8.bf16 %v385_v12  ;;  %v1960_v17 = vld [vmem:[%s2605_s28 + $0x70] sm:$0xff]   ;;  %v1962_v19 = vld [vmem:[%s2605_s28 + $0x78] sm:$0xff]   ;;  %v403_v25 = vunpack.c.h.s8.bf16 %v385_v12 }
  0xef   : > { %v417_v15 = vunpack.c.l.s8.bf16 %v393_v13  ;;  %v1959_v16 = vld [vmem:[%s2605_s28 + $0x28] sm:$0xff]   ;;  %v1961_v18 = vld [vmem:[%s2605_s28 + $0x30] sm:$0xff]   ;;  %v1963_v20 = vld [vmem:[%s2605_s28 + $0x38] sm:$0xff]   ;;  %v419_v26 = vunpack.c.h.s8.bf16 %v393_v13 }
  0xf0   : > { %1598 = vmatpush3.bf16.msra.mxu0 %v1951_v4  ;;  %1788 = vmatpush3.bf16.msra.mxu1 %v1951_v4  ;;  %v384_v21 = vld [vmem:[%s2597_s8] sm:$0xff]  ;;  %v387_v27 = vld [vmem:[%s2597_s8 + $0x18] sm:$0xff]  ;;  %v386_v33 = vld [vmem:[%s2597_s8 + $0x10] sm:$0xff]  ;;  %p1419_p8 = scmp.ne.s32.totalorder %s2654_s20, 1 }
  0xf1   : > { %1599 = vmatprep.subr.bf16.mxu0 %v1952_v5  ;;  %1781 = vmatprep.subr.bf16.mxu1 %v1952_v5  ;;  %v392_v22 = vld [vmem:[%s2597_s8 + $0x40] sm:$0xff]  ;;  %v400_v23 = vunpack.c.l.s8.bf16 %v384_v21  ;;  %v395_v28 = vld [vmem:[%s2597_s8 + $0x58] sm:$0xff]  ;;  %v402_v29 = vunpack.c.h.s8.bf16 %v384_v21  ;;  %v405_v31 = vunpack.c.l.s8.bf16 %v387_v27  ;;  %v394_v34 = vld [vmem:[%s2597_s8 + $0x50] sm:$0xff]  ;;  %v404_v35 = vunpack.c.l.s8.bf16 %v386_v33 }
  0xf2   : > { %592 = vmatprep.mubr.bf16.mxu0 %v401_v14  ;;  %656 = vmatprep.mubr.bf16.mxu1 %v417_v15  ;;  %v416_v24 = vunpack.c.l.s8.bf16 %v392_v22  ;;  %v418_v30 = vunpack.c.h.s8.bf16 %v392_v22  ;;  %v421_v32 = vunpack.c.l.s8.bf16 %v395_v28  ;;  %v420_v36 = vunpack.c.l.s8.bf16 %v394_v34  ;;  %v389_v39 = vld [vmem:[%s2597_s8 + $0x28] sm:$0xff]  ;;  %v388_v45 = vld [vmem:[%s2597_s8 + $0x20] sm:$0xff]  ;;  %v391_v51 = vld [vmem:[%s2597_s8 + $0x38] sm:$0xff] }
  0xf3   : > { %v407_v37 = vunpack.c.h.s8.bf16 %v387_v27  ;;  %v423_v38 = vunpack.c.h.s8.bf16 %v395_v28  ;;  %v397_v40 = vld [vmem:[%s2597_s8 + $0x68] sm:$0xff]  ;;  %v406_v41 = vunpack.c.h.s8.bf16 %v386_v33  ;;  %v422_v42 = vunpack.c.h.s8.bf16 %v394_v34  ;;  %v396_v46 = vld [vmem:[%s2597_s8 + $0x60] sm:$0xff]  ;;  %v399_v52 = vld [vmem:[%s2597_s8 + $0x78] sm:$0xff] }
  0xf4   : > { %1600 = vmatpush3.bf16.msra.mxu0 %v1953_v6  ;;  %1789 = vmatpush3.bf16.msra.mxu1 %v1953_v6  ;;  %v409_v43 = vunpack.c.l.s8.bf16 %v389_v39  ;;  %v425_v44 = vunpack.c.l.s8.bf16 %v397_v40  ;;  %v408_v47 = vunpack.c.l.s8.bf16 %v388_v45  ;;  %v424_v48 = vunpack.c.l.s8.bf16 %v396_v46  ;;  %v390_v57 = vld [vmem:[%s2597_s8 + $0x30] sm:$0xff]  ;;  %v352_v3 = vld [vmem:[#allocation2] sm:$0xff]  ;;  %v369_v13 = vld [vmem:[#allocation2 + $0x88] sm:$0xff] }
  0xf5   : > { %1601 = vmatprep.subr.bf16.mxu0 %v1954_v7  ;;  %1782 = vmatprep.subr.bf16.mxu1 %v1954_v7  ;;  %v411_v49 = vunpack.c.h.s8.bf16 %v389_v39  ;;  %v427_v50 = vunpack.c.h.s8.bf16 %v397_v40  ;;  %v410_v53 = vunpack.c.h.s8.bf16 %v388_v45  ;;  %v426_v54 = vunpack.c.h.s8.bf16 %v396_v46  ;;  %v398_v58 = vld [vmem:[%s2597_s8 + $0x70] sm:$0xff]  ;;  %v368_v5 = vld [vmem:[#allocation2 + $0x80] sm:$0xff]  ;;  %v371_v33 = vld [vmem:[#allocation2 + $0x98] sm:$0xff] }
  0xf6   : > { %v413_v55 = vunpack.c.l.s8.bf16 %v391_v51  ;;  %v429_v56 = vunpack.c.l.s8.bf16 %v399_v52  ;;  %v412_v59 = vunpack.c.l.s8.bf16 %v390_v57  ;;  %v428_v60 = vunpack.c.l.s8.bf16 %v398_v58  ;;  %v372_v45 = vld [vmem:[#allocation2 + $0xa0] sm:$0xff] }
  0xf7   : > { %v415_v61 = vunpack.c.h.s8.bf16 %v391_v51  ;;  %v431_v62 = vunpack.c.h.s8.bf16 %v399_v52  ;;  %v414_v63 = vunpack.c.h.s8.bf16 %v390_v57  ;;  %v430_v0 = vunpack.c.h.s8.bf16 %v398_v58  ;;  %v357_v51 = vld [vmem:[#allocation2 + $0x28] sm:$0xff] }
  0xf8   : > { %1602 = vmatpush3.bf16.msra.mxu0 %v1955_v8  ;;  %1790 = vmatpush3.bf16.msra.mxu1 %v1955_v8 }
  0xf9   : > { %1603 = vmatprep.subr.bf16.mxu0 %v1956_v9  ;;  %1783 = vmatprep.subr.bf16.mxu1 %v1956_v9 }
  0xfc   : > { %1604 = vmatpush3.bf16.msra.mxu0 %v1957_v10  ;;  %1791 = vmatpush3.bf16.msra.mxu1 %v1957_v10 }
  0xfd   : > { %1605 = vmatprep.subr.bf16.mxu0 %v1958_v11  ;;  %1784 = vmatprep.subr.bf16.mxu1 %v1958_v11  ;;  %v353_v11 = vld [vmem:[#allocation2 + $0x8] sm:$0xff] }
 0x100   : > { %1606 = vmatpush3.bf16.msra.mxu0 %v1959_v16  ;;  %1792 = vmatpush3.bf16.msra.mxu1 %v1959_v16 }
 0x101   : > { %1607 = vmatprep.subr.bf16.mxu0 %v1960_v17  ;;  %1785 = vmatprep.subr.bf16.mxu1 %v1960_v17 }
 0x104   : > { %1608 = vmatpush3.bf16.msra.mxu0 %v1961_v18  ;;  %1793 = vmatpush3.bf16.msra.mxu1 %v1961_v18 }
 0x105   : > { %1609 = vmatprep.subr.bf16.mxu0 %v1962_v19  ;;  %1786 = vmatprep.subr.bf16.mxu1 %v1962_v19 }
 0x108   : > { %1610 = vmatpush3.bf16.msra.mxu0 %v1963_v20  ;;  %1794 = vmatpush3.bf16.msra.mxu1 %v1963_v20 }
 0x10b   : > { %593 = vmatmul.mubr.bf16.vlgmr.msra.gmra.mrb[0].mxu0 %v400_v23  ;;  %657 = vmatmul.mubr.bf16.vlgmr.msra.gmra.mrb[0].mxu1 %v416_v24  ;;  %v354_v23 = vld [vmem:[#allocation2 + $0x10] sm:$0xff] }
 0x10c   : > { %600 = vmatprep.mubr.bf16.mxu0 %v403_v25  ;;  %664 = vmatprep.mubr.bf16.mxu1 %v419_v26  ;;  %v370_v25 = vld [vmem:[#allocation2 + $0x90] sm:$0xff] }
 0x113   : > { %601 = vmatmul.mubr.bf16.gmra.mrb[4].mxu0 %v402_v29  ;;  %665 = vmatmul.mubr.bf16.gmra.mrb[4].mxu1 %v418_v30 }
 0x114   : > { %608 = vmatprep.mubr.bf16.mxu0 %v405_v31  ;;  %672 = vmatprep.mubr.bf16.mxu1 %v421_v32  ;;  %v355_v31 = vld [vmem:[#allocation2 + $0x18] sm:$0xff] }
 0x11b   : > { %609 = vmatmul.mubr.bf16.gmra.mrb[8].mxu0 %v404_v35  ;;  %673 = vmatmul.mubr.bf16.gmra.mrb[8].mxu1 %v420_v36 }
 0x11c   : > { %616 = vmatprep.mubr.bf16.mxu0 %v407_v37  ;;  %680 = vmatprep.mubr.bf16.mxu1 %v423_v38 }
 0x123   : > { %617 = vmatmul.mubr.bf16.gmra.mrb[12].mxu0 %v406_v41  ;;  %681 = vmatmul.mubr.bf16.gmra.mrb[12].mxu1 %v422_v42 }
 0x124   : > { %624 = vmatprep.mubr.bf16.mxu0 %v409_v43  ;;  %688 = vmatprep.mubr.bf16.mxu1 %v425_v44  ;;  %v356_v43 = vld [vmem:[#allocation2 + $0x20] sm:$0xff] }
 0x12b   : > { %625 = vmatmul.mubr.bf16.gmra.mrb[16].mxu0 %v408_v47  ;;  %689 = vmatmul.mubr.bf16.gmra.mrb[16].mxu1 %v424_v48 }
 0x12c   : > { %632 = vmatprep.mubr.bf16.mxu0 %v411_v49  ;;  %696 = vmatprep.mubr.bf16.mxu1 %v427_v50 }
 0x133   : > { %633 = vmatmul.mubr.bf16.gmra.mrb[20].mxu0 %v410_v53  ;;  %697 = vmatmul.mubr.bf16.gmra.mrb[20].mxu1 %v426_v54  ;;  %v373_v53 = vld [vmem:[#allocation2 + $0xa8] sm:$0xff] }
 0x134   : > { %640 = vmatprep.mubr.bf16.mxu0 %v413_v55  ;;  %704 = vmatprep.mubr.bf16.mxu1 %v429_v56 }
 0x13b   : > { %641 = vmatmul.mubr.bf16.gmra.mrb[24].mxu0 %v412_v59  ;;  %705 = vmatmul.mubr.bf16.gmra.mrb[24].mxu1 %v428_v60 }
 0x13c   : > { %648 = vmatprep.mubr.bf16.mxu0 %v415_v61  ;;  %712 = vmatprep.mubr.bf16.mxu1 %v431_v62 }
 0x143   : > { %649 = vmatmul.mubr.bf16.gmra.mrb[28].mxu0 %v414_v63  ;;  %713 = vmatmul.mubr.bf16.gmra.mrb[28].mxu1 %v430_v0  ;;  %v358_v63 = vld [vmem:[#allocation2 + $0x30] sm:$0xff] }
 0x1de   : > { %v1611_v1 = vpop.f32.mrb[0].mxu0  ;;  %v1659_v2 = vpop.f32.mrb[0].mxu1 }
 0x1df   : > { %v1612_v4 = vpop.f32.mrb[1].mxu0  ;;  %v1660_v6 = vpop.f32.mrb[1].mxu1 }
 0x1e0   : > { %v1613_v7 = vadd.f32 %v1612_v4, %v1611_v1  ;;  %v1661_v8 = vadd.f32 %v1660_v6, %v1659_v2  ;;  %v1614_v9 = vpop.f32.mrb[2].mxu0  ;;  %v1662_v10 = vpop.f32.mrb[2].mxu1  ;;  %v374_v1 = vld [vmem:[#allocation2 + $0xb0] sm:$0xff] }
 0x1e1   : > { %v1615_v12 = vpop.f32.mrb[3].mxu0  ;;  %v1663_v14 = vpop.f32.mrb[3].mxu1 }
 0x1e2   : > { %v721_v15 = vadd.f32 %v1613_v7, %v352_v3  ;;  %v737_v16 = vadd.f32 %v1661_v8, %v368_v5  ;;  %v1616_v17 = vadd.f32 %v1615_v12, %v1614_v9  ;;  %v1664_v18 = vadd.f32 %v1663_v14, %v1662_v10  ;;  %v359_v7 = vld [vmem:[#allocation2 + $0x38] sm:$0xff] }
 0x1e3   : > { %v375_v9 = vld [vmem:[#allocation2 + $0xb8] sm:$0xff] }
 0x1e4   : > { %753 = vst [vmem:[#allocation2] sm:$0xff] %v721_v15  ;;  %769 = vst [vmem:[#allocation2 + $0x80] sm:$0xff] %v737_v16  ;;  %v722_v19 = vadd.f32 %v1616_v17, %v353_v11  ;;  %v738_v20 = vadd.f32 %v1664_v18, %v369_v13 }
 0x1e6   : > { %754 = vst [vmem:[#allocation2 + $0x8] sm:$0xff] %v722_v19  ;;  %770 = vst [vmem:[#allocation2 + $0x88] sm:$0xff] %v738_v20  ;;  %v1617_v21 = vpop.f32.mrb[4].mxu0  ;;  %v1665_v22 = vpop.f32.mrb[4].mxu1  ;;  %v360_v19 = vld [vmem:[#allocation2 + $0x40] sm:$0xff] }
 0x1e7   : > { %v1618_v24 = vpop.f32.mrb[5].mxu0  ;;  %v1666_v26 = vpop.f32.mrb[5].mxu1 }
 0x1e8   : > { %v1619_v27 = vadd.f32 %v1618_v24, %v1617_v21  ;;  %v1667_v28 = vadd.f32 %v1666_v26, %v1665_v22  ;;  %v1620_v29 = vpop.f32.mrb[6].mxu0  ;;  %v1668_v30 = vpop.f32.mrb[6].mxu1  ;;  %v376_v21 = vld [vmem:[#allocation2 + $0xc0] sm:$0xff] }
 0x1e9   : > { %v1621_v32 = vpop.f32.mrb[7].mxu0  ;;  %v1669_v34 = vpop.f32.mrb[7].mxu1 }
 0x1ea   : > { %v723_v35 = vadd.f32 %v1619_v27, %v354_v23  ;;  %v739_v36 = vadd.f32 %v1667_v28, %v370_v25  ;;  %v1622_v37 = vadd.f32 %v1621_v32, %v1620_v29  ;;  %v1670_v38 = vadd.f32 %v1669_v34, %v1668_v30  ;;  %v361_v27 = vld [vmem:[#allocation2 + $0x48] sm:$0xff] }
 0x1eb   : > { %v377_v29 = vld [vmem:[#allocation2 + $0xc8] sm:$0xff] }
 0x1ec   : > { %755 = vst [vmem:[#allocation2 + $0x10] sm:$0xff] %v723_v35  ;;  %771 = vst [vmem:[#allocation2 + $0x90] sm:$0xff] %v739_v36  ;;  %v724_v39 = vadd.f32 %v1622_v37, %v355_v31  ;;  %v740_v40 = vadd.f32 %v1670_v38, %v371_v33 }
 0x1ee   : > { %756 = vst [vmem:[#allocation2 + $0x18] sm:$0xff] %v724_v39  ;;  %772 = vst [vmem:[#allocation2 + $0x98] sm:$0xff] %v740_v40  ;;  %v1623_v41 = vpop.f32.mrb[8].mxu0  ;;  %v1671_v42 = vpop.f32.mrb[8].mxu1  ;;  %v362_v39 = vld [vmem:[#allocation2 + $0x50] sm:$0xff] }
 0x1ef   : > { %v1624_v44 = vpop.f32.mrb[9].mxu0  ;;  %v1672_v46 = vpop.f32.mrb[9].mxu1 }
 0x1f0   : > { %v1625_v47 = vadd.f32 %v1624_v44, %v1623_v41  ;;  %v1673_v48 = vadd.f32 %v1672_v46, %v1671_v42  ;;  %v1626_v49 = vpop.f32.mrb[10].mxu0  ;;  %v1674_v50 = vpop.f32.mrb[10].mxu1  ;;  %v378_v41 = vld [vmem:[#allocation2 + $0xd0] sm:$0xff] }
 0x1f1   : > { %v1627_v52 = vpop.f32.mrb[11].mxu0  ;;  %v1675_v54 = vpop.f32.mrb[11].mxu1 }
 0x1f2   : > { %v725_v55 = vadd.f32 %v1625_v47, %v356_v43  ;;  %v741_v56 = vadd.f32 %v1673_v48, %v372_v45  ;;  %v1628_v57 = vadd.f32 %v1627_v52, %v1626_v49  ;;  %v1676_v58 = vadd.f32 %v1675_v54, %v1674_v50  ;;  %v363_v47 = vld [vmem:[#allocation2 + $0x58] sm:$0xff] }
 0x1f3   : > { %v379_v49 = vld [vmem:[#allocation2 + $0xd8] sm:$0xff] }
 0x1f4   : > { %757 = vst [vmem:[#allocation2 + $0x20] sm:$0xff] %v725_v55  ;;  %773 = vst [vmem:[#allocation2 + $0xa0] sm:$0xff] %v741_v56  ;;  %v726_v59 = vadd.f32 %v1628_v57, %v357_v51  ;;  %v742_v60 = vadd.f32 %v1676_v58, %v373_v53 }
 0x1f6   : > { %758 = vst [vmem:[#allocation2 + $0x28] sm:$0xff] %v726_v59  ;;  %774 = vst [vmem:[#allocation2 + $0xa8] sm:$0xff] %v742_v60  ;;  %v1629_v61 = vpop.f32.mrb[12].mxu0  ;;  %v1677_v62 = vpop.f32.mrb[12].mxu1  ;;  %v364_v59 = vld [vmem:[#allocation2 + $0x60] sm:$0xff] }
 0x1f7   : > { %v1630_v0 = vpop.f32.mrb[13].mxu0  ;;  %v1678_v2 = vpop.f32.mrb[13].mxu1 }
 0x1f8   : > { %v1631_v3 = vadd.f32 %v1630_v0, %v1629_v61  ;;  %v1679_v4 = vadd.f32 %v1678_v2, %v1677_v62  ;;  %v1632_v5 = vpop.f32.mrb[14].mxu0  ;;  %v1680_v6 = vpop.f32.mrb[14].mxu1  ;;  %v380_v61 = vld [vmem:[#allocation2 + $0xe0] sm:$0xff] }
 0x1f9   : > { %v1633_v8 = vpop.f32.mrb[15].mxu0  ;;  %v1681_v10 = vpop.f32.mrb[15].mxu1 }
 0x1fa   : > { %v727_v11 = vadd.f32 %v1631_v3, %v358_v63  ;;  %v743_v12 = vadd.f32 %v1679_v4, %v374_v1  ;;  %v1634_v13 = vadd.f32 %v1633_v8, %v1632_v5  ;;  %v1682_v14 = vadd.f32 %v1681_v10, %v1680_v6  ;;  %v365_v3 = vld [vmem:[#allocation2 + $0x68] sm:$0xff] }
 0x1fb   : > { %v381_v5 = vld [vmem:[#allocation2 + $0xe8] sm:$0xff] }
 0x1fc   : > { %759 = vst [vmem:[#allocation2 + $0x30] sm:$0xff] %v727_v11  ;;  %775 = vst [vmem:[#allocation2 + $0xb0] sm:$0xff] %v743_v12  ;;  %v728_v15 = vadd.f32 %v1634_v13, %v359_v7  ;;  %v744_v16 = vadd.f32 %v1682_v14, %v375_v9 }
 0x1fe   : > { %760 = vst [vmem:[#allocation2 + $0x38] sm:$0xff] %v728_v15  ;;  %776 = vst [vmem:[#allocation2 + $0xb8] sm:$0xff] %v744_v16  ;;  %v1635_v17 = vpop.f32.mrb[16].mxu0  ;;  %v1683_v18 = vpop.f32.mrb[16].mxu1  ;;  %v366_v15 = vld [vmem:[#allocation2 + $0x70] sm:$0xff] }
 0x1ff   : > { %v1636_v20 = vpop.f32.mrb[17].mxu0  ;;  %v1684_v22 = vpop.f32.mrb[17].mxu1 }
 0x200   : > { %v1637_v23 = vadd.f32 %v1636_v20, %v1635_v17  ;;  %v1685_v24 = vadd.f32 %v1684_v22, %v1683_v18  ;;  %v1638_v25 = vpop.f32.mrb[18].mxu0  ;;  %v1686_v26 = vpop.f32.mrb[18].mxu1  ;;  %v382_v17 = vld [vmem:[#allocation2 + $0xf0] sm:$0xff] }
 0x201   : > { %v1639_v28 = vpop.f32.mrb[19].mxu0  ;;  %v1687_v30 = vpop.f32.mrb[19].mxu1 }
 0x202   : > { %v729_v31 = vadd.f32 %v1637_v23, %v360_v19  ;;  %v745_v32 = vadd.f32 %v1685_v24, %v376_v21  ;;  %v1640_v33 = vadd.f32 %v1639_v28, %v1638_v25  ;;  %v1688_v34 = vadd.f32 %v1687_v30, %v1686_v26  ;;  %v367_v23 = vld [vmem:[#allocation2 + $0x78] sm:$0xff] }
 0x203   : > { %v383_v25 = vld [vmem:[#allocation2 + $0xf8] sm:$0xff] }
 0x204   : > { %761 = vst [vmem:[#allocation2 + $0x40] sm:$0xff] %v729_v31  ;;  %777 = vst [vmem:[#allocation2 + $0xc0] sm:$0xff] %v745_v32  ;;  %v730_v35 = vadd.f32 %v1640_v33, %v361_v27  ;;  %v746_v36 = vadd.f32 %v1688_v34, %v377_v29  ;;  %v1964_v33 = vld [vmem:[#allocation13] sm:$0xff] (!%p1419_p8)   ;;  %v1965_v34 = vld [vmem:[#allocation13 + $0x8] sm:$0xff] (!%p1419_p8)  }
 0x205   : > { %1731 = vmatprep.subr.bf16.mxu0 (!%p1419_p8), %v1964_v33  ;;  %1795 = vmatprep.subr.bf16.mxu1 (!%p1419_p8), %v1964_v33 }
 0x206   : > { %762 = vst [vmem:[#allocation2 + $0x48] sm:$0xff] %v730_v35  ;;  %778 = vst [vmem:[#allocation2 + $0xc8] sm:$0xff] %v746_v36  ;;  %v1641_v37 = vpop.f32.mrb[20].mxu0  ;;  %v1689_v38 = vpop.f32.mrb[20].mxu1  ;;  %1732 = vmatpush3.bf16.msra.mxu0 (!%p1419_p8), %v1964_v33  ;;  %1803 = vmatpush3.bf16.msra.mxu1 (!%p1419_p8), %v1964_v33  ;;  %v1966_v35 = vld [vmem:[#allocation13 + $0x10] sm:$0xff] (!%p1419_p8)   ;;  %v1967_v36 = vld [vmem:[#allocation13 + $0x18] sm:$0xff] (!%p1419_p8)  }
 0x207   : > { %v1642_v40 = vpop.f32.mrb[21].mxu0  ;;  %v1690_v42 = vpop.f32.mrb[21].mxu1  ;;  %1733 = vmatprep.subr.bf16.mxu0 (!%p1419_p8), %v1965_v34  ;;  %1796 = vmatprep.subr.bf16.mxu1 (!%p1419_p8), %v1965_v34 }
 0x208   : > { %v1643_v43 = vadd.f32 %v1642_v40, %v1641_v37  ;;  %v1691_v44 = vadd.f32 %v1690_v42, %v1689_v38  ;;  %v1644_v45 = vpop.f32.mrb[22].mxu0  ;;  %v1692_v46 = vpop.f32.mrb[22].mxu1  ;;  %v790_v37 = vld [vmem:[#allocation2] sm:$0xff] (!%p1419_p8)  ;;  %v791_v38 = vld [vmem:[#allocation2 + $0x8] sm:$0xff] (!%p1419_p8) }
 0x209   : > { %v1645_v48 = vpop.f32.mrb[23].mxu0  ;;  %v1693_v50 = vpop.f32.mrb[23].mxu1  ;;  %v822_v40 = vpack.c.bf16 (!%p1419_p8), %v791_v38, %v790_v37 }
 0x20a   : > { %v731_v51 = vadd.f32 %v1643_v43, %v362_v39  ;;  %v747_v52 = vadd.f32 %v1691_v44, %v378_v41  ;;  %v1646_v53 = vadd.f32 %v1645_v48, %v1644_v45  ;;  %v1694_v54 = vadd.f32 %v1693_v50, %v1692_v46  ;;  %1734 = vmatpush3.bf16.msra.mxu0 (!%p1419_p8), %v1965_v34  ;;  %v806_v39 = vld [vmem:[#allocation2 + $0x80] sm:$0xff] (!%p1419_p8)  ;;  %v807_v41 = vld [vmem:[#allocation2 + $0x88] sm:$0xff] (!%p1419_p8)  ;;  %v1970_v45 = vld [vmem:[#allocation13 + $0x30] sm:$0xff] (!%p1419_p8)  }
 0x20b   : > { %1804 = vmatpush3.bf16.msra.mxu1 (!%p1419_p8), %v1965_v34  ;;  %1735 = vmatprep.subr.bf16.mxu0 (!%p1419_p8), %v1966_v35  ;;  %v830_v42 = vpack.c.bf16 (!%p1419_p8), %v807_v41, %v806_v39  ;;  %v1968_v43 = vld [vmem:[#allocation13 + $0x20] sm:$0xff] (!%p1419_p8)   ;;  %v1969_v44 = vld [vmem:[#allocation13 + $0x28] sm:$0xff] (!%p1419_p8)   ;;  %v1971_v46 = vld [vmem:[#allocation13 + $0x38] sm:$0xff] (!%p1419_p8)  }
 0x20c   : > { %763 = vst [vmem:[#allocation2 + $0x50] sm:$0xff] %v731_v51  ;;  %779 = vst [vmem:[#allocation2 + $0xd0] sm:$0xff] %v747_v52  ;;  %v732_v55 = vadd.f32 %v1646_v53, %v363_v47  ;;  %v748_v56 = vadd.f32 %v1694_v54, %v379_v49  ;;  %1797 = vmatprep.subr.bf16.mxu1 (!%p1419_p8), %v1966_v35  ;;  %1747 = vmatprep.mubr.bf16.mxu0 (!%p1419_p8), %v822_v40  ;;  %v792_v47 = vld [vmem:[#allocation2 + $0x10] sm:$0xff] (!%p1419_p8)  ;;  %v793_v48 = vld [vmem:[#allocation2 + $0x18] sm:$0xff] (!%p1419_p8) }
 0x20d   : > { %1763 = vmatprep.mubr.bf16.mxu1 (!%p1419_p8), %v830_v42  ;;  %v808_v49 = vld [vmem:[#allocation2 + $0x90] sm:$0xff] (!%p1419_p8)  ;;  %v809_v50 = vld [vmem:[#allocation2 + $0x98] sm:$0xff] (!%p1419_p8)  ;;  %v794_v51 = vld [vmem:[#allocation2 + $0x20] sm:$0xff] (!%p1419_p8) }
 0x20e   : > { %764 = vst [vmem:[#allocation2 + $0x58] sm:$0xff] %v732_v55  ;;  %780 = vst [vmem:[#allocation2 + $0xd8] sm:$0xff] %v748_v56  ;;  %v1647_v57 = vpop.f32.mrb[24].mxu0  ;;  %v1695_v58 = vpop.f32.mrb[24].mxu1  ;;  %1736 = vmatpush3.bf16.msra.mxu0 (!%p1419_p8), %v1966_v35  ;;  %v795_v52 = vld [vmem:[#allocation2 + $0x28] sm:$0xff] (!%p1419_p8)  ;;  %v810_v53 = vld [vmem:[#allocation2 + $0xa0] sm:$0xff] (!%p1419_p8)  ;;  %v823_v55 = vpack.c.bf16 (!%p1419_p8), %v793_v48, %v792_v47  ;;  %v831_v56 = vpack.c.bf16 (!%p1419_p8), %v809_v50, %v808_v49 }
 0x20f   : > { %v1648_v60 = vpop.f32.mrb[25].mxu0  ;;  %v1696_v62 = vpop.f32.mrb[25].mxu1  ;;  %1805 = vmatpush3.bf16.msra.mxu1 (!%p1419_p8), %v1966_v35  ;;  %1737 = vmatprep.subr.bf16.mxu0 (!%p1419_p8), %v1967_v36  ;;  %v811_v54 = vld [vmem:[#allocation2 + $0xa8] sm:$0xff] (!%p1419_p8) }
 0x210   : > { %v1649_v63 = vadd.f32 %v1648_v60, %v1647_v57  ;;  %v1697_v0 = vadd.f32 %v1696_v62, %v1695_v58  ;;  %v1650_v1 = vpop.f32.mrb[26].mxu0  ;;  %v1698_v2 = vpop.f32.mrb[26].mxu1  ;;  %1798 = vmatprep.subr.bf16.mxu1 (!%p1419_p8), %v1967_v36  ;;  %v824_v57 = vpack.c.bf16 (!%p1419_p8), %v795_v52, %v794_v51  ;;  %v832_v58 = vpack.c.bf16 (!%p1419_p8), %v811_v54, %v810_v53  ;;  %v797_v60 = vld [vmem:[#allocation2 + $0x38] sm:$0xff] (!%p1419_p8) }
 0x211   : > { %v1651_v4 = vpop.f32.mrb[27].mxu0  ;;  %v1699_v6 = vpop.f32.mrb[27].mxu1  ;;  %v813_v62 = vld [vmem:[#allocation2 + $0xb8] sm:$0xff] (!%p1419_p8) }
 0x212   : > { %v733_v7 = vadd.f32 %v1649_v63, %v364_v59  ;;  %v749_v8 = vadd.f32 %v1697_v0, %v380_v61  ;;  %v1652_v9 = vadd.f32 %v1651_v4, %v1650_v1  ;;  %v1700_v10 = vadd.f32 %v1699_v6, %v1698_v2  ;;  %1738 = vmatpush3.bf16.msra.mxu0 (!%p1419_p8), %v1967_v36  ;;  %v796_v59 = vld [vmem:[#allocation2 + $0x30] sm:$0xff] (!%p1419_p8)  ;;  %v798_v63 = vld [vmem:[#allocation2 + $0x40] sm:$0xff] (!%p1419_p8)  ;;  %v799_v0 = vld [vmem:[#allocation2 + $0x48] sm:$0xff] (!%p1419_p8) }
 0x213   : > { %1806 = vmatpush3.bf16.msra.mxu1 (!%p1419_p8), %v1967_v36  ;;  %1739 = vmatprep.subr.bf16.mxu0 (!%p1419_p8), %v1968_v43  ;;  %v812_v61 = vld [vmem:[#allocation2 + $0xb0] sm:$0xff] (!%p1419_p8)  ;;  %v814_v1 = vld [vmem:[#allocation2 + $0xc0] sm:$0xff] (!%p1419_p8)  ;;  %v815_v2 = vld [vmem:[#allocation2 + $0xc8] sm:$0xff] (!%p1419_p8) }
 0x214   : > { %765 = vst [vmem:[#allocation2 + $0x60] sm:$0xff] %v733_v7  ;;  %781 = vst [vmem:[#allocation2 + $0xe0] sm:$0xff] %v749_v8  ;;  %v734_v11 = vadd.f32 %v1652_v9, %v365_v3  ;;  %v750_v12 = vadd.f32 %v1700_v10, %v381_v5  ;;  %1799 = vmatprep.subr.bf16.mxu1 (!%p1419_p8), %v1968_v43  ;;  %v825_v3 = vpack.c.bf16 (!%p1419_p8), %v797_v60, %v796_v59  ;;  %v800_v7 = vld [vmem:[#allocation2 + $0x50] sm:$0xff] (!%p1419_p8) }
 0x215   : > { %v833_v4 = vpack.c.bf16 (!%p1419_p8), %v813_v62, %v812_v61  ;;  %v826_v5 = vpack.c.bf16 (!%p1419_p8), %v799_v0, %v798_v63  ;;  %v834_v6 = vpack.c.bf16 (!%p1419_p8), %v815_v2, %v814_v1  ;;  %v801_v8 = vld [vmem:[#allocation2 + $0x58] sm:$0xff] (!%p1419_p8)  ;;  %v816_v9 = vld [vmem:[#allocation2 + $0xd0] sm:$0xff] (!%p1419_p8) }
 0x216   : > { %766 = vst [vmem:[#allocation2 + $0x68] sm:$0xff] %v734_v11  ;;  %782 = vst [vmem:[#allocation2 + $0xe8] sm:$0xff] %v750_v12  ;;  %v1653_v13 = vpop.f32.mrb[28].mxu0  ;;  %v1701_v14 = vpop.f32.mrb[28].mxu1  ;;  %1740 = vmatpush3.bf16.msra.mxu0 (!%p1419_p8), %v1968_v43  ;;  %v817_v10 = vld [vmem:[#allocation2 + $0xd8] sm:$0xff] (!%p1419_p8) }
 0x217   : > { %v1654_v16 = vpop.f32.mrb[29].mxu0  ;;  %v1702_v18 = vpop.f32.mrb[29].mxu1  ;;  %1807 = vmatpush3.bf16.msra.mxu1 (!%p1419_p8), %v1968_v43  ;;  %1741 = vmatprep.subr.bf16.mxu0 (!%p1419_p8), %v1969_v44 }
 0x218   : > { %v1655_v19 = vadd.f32 %v1654_v16, %v1653_v13  ;;  %v1703_v20 = vadd.f32 %v1702_v18, %v1701_v14  ;;  %v1656_v21 = vpop.f32.mrb[30].mxu0  ;;  %v1704_v22 = vpop.f32.mrb[30].mxu1  ;;  %789 = sbr.rel (%p1419_p8) target bundleno = 796 (0x31c), region = 56  ;;  %1800 = vmatprep.subr.bf16.mxu1 (!%p1419_p8), %v1969_v44  ;;  %v835_v16 = vpack.c.bf16 (!%p1419_p8), %v817_v10, %v816_v9 }
 0x219   : > { %v1657_v24 = vpop.f32.mrb[31].mxu0  ;;  %v1705_v26 = vpop.f32.mrb[31].mxu1 }
 0x21a   : > { %v735_v27 = vadd.f32 %v1655_v19, %v366_v15  ;;  %v751_v28 = vadd.f32 %v1703_v20, %v382_v17  ;;  %v1658_v29 = vadd.f32 %v1657_v24, %v1656_v21  ;;  %v1706_v30 = vadd.f32 %v1705_v26, %v1704_v22  ;;  %1742 = vmatpush3.bf16.msra.mxu0 (!%p1419_p8), %v1969_v44 }
 0x21b   : > { %1808 = vmatpush3.bf16.msra.mxu1 (!%p1419_p8), %v1969_v44  ;;  %1743 = vmatprep.subr.bf16.mxu0 (!%p1419_p8), %v1970_v45  ;;  %v802_v11 = vld [vmem:[#allocation2 + $0x60] sm:$0xff] (!%p1419_p8)  ;;  %v827_v15 = vpack.c.bf16 (!%p1419_p8), %v801_v8, %v800_v7 }
 0x21c   : > { %767 = vst [vmem:[#allocation2 + $0x70] sm:$0xff] %v735_v27  ;;  %783 = vst [vmem:[#allocation2 + $0xf0] sm:$0xff] %v751_v28  ;;  %v736_v31 = vadd.f32 %v1658_v29, %v367_v23  ;;  %v752_v32 = vadd.f32 %v1706_v30, %v383_v25  ;;  %1801 = vmatprep.subr.bf16.mxu1 (!%p1419_p8), %v1970_v45  ;;  %v818_v13 = vld [vmem:[#allocation2 + $0xe0] sm:$0xff] (!%p1419_p8) }
 0x21d   : > { %v803_v12 = vld [vmem:[#allocation2 + $0x68] sm:$0xff] (!%p1419_p8)  ;;  %v2660_v25 = vld [vmem:[%s2788_s7] ss:$0 sm:$0xff] (!%p1419_p8) }
 0x21e   : > { %768 = vst [vmem:[#allocation2 + $0x78] sm:$0xff] %v736_v31  ;;  %784 = vst [vmem:[#allocation2 + $0xf8] sm:$0xff] %v752_v32  ;;  %1744 = vmatpush3.bf16.msra.mxu0 (!%p1419_p8), %v1970_v45  ;;  %v819_v14 = vld [vmem:[#allocation2 + $0xe8] sm:$0xff] (!%p1419_p8)  ;;  %v828_v17 = vpack.c.bf16 (!%p1419_p8), %v803_v12, %v802_v11 }
 0x21f   : > { %1809 = vmatpush3.bf16.msra.mxu1 %v1970_v45  ;;  %1745 = vmatprep.subr.bf16.mxu0 %v1971_v46  ;;  %v836_v18 = vpack.c.bf16 %v819_v14, %v818_v13 }
 0x220   : > { %1802 = vmatprep.subr.bf16.mxu1 %v1971_v46 }
 0x222   : > { %1746 = vmatpush3.bf16.msra.mxu0 %v1971_v46 }
 0x223   : > { %1810 = vmatpush3.bf16.msra.mxu1 %v1971_v46  ;;  %v804_v19 = vld [vmem:[#allocation2 + $0x70] sm:$0xff] }
 0x224   : > { %v820_v21 = vld [vmem:[#allocation2 + $0xf0] sm:$0xff] }
 0x225   : > { %1748 = vmatmul.mubr.bf16.vlgmr.msra.gmra.mrb[0].mxu0 %v823_v55  ;;  %v805_v20 = vld [vmem:[#allocation2 + $0x78] sm:$0xff] }
 0x226   : > { %1764 = vmatmul.mubr.bf16.vlgmr.msra.gmra.mrb[0].mxu1 %v831_v56  ;;  %1751 = vmatprep.mubr.bf16.mxu0 %v824_v57  ;;  %v821_v22 = vld [vmem:[#allocation2 + $0xf8] sm:$0xff]  ;;  %v829_v23 = vpack.c.bf16 %v805_v20, %v804_v19 }
 0x227   : > { %1767 = vmatprep.mubr.bf16.mxu1 %v832_v58  ;;  %v837_v24 = vpack.c.bf16 %v821_v22, %v820_v21 }
 0x22d   : > { %1752 = vmatmul.mubr.bf16.gmra.mrb[4].mxu0 %v825_v3 }
 0x22e   : > { %1768 = vmatmul.mubr.bf16.gmra.mrb[4].mxu1 %v833_v4  ;;  %1755 = vmatprep.mubr.bf16.mxu0 %v826_v5 }
 0x22f   : > { %1771 = vmatprep.mubr.bf16.mxu1 %v834_v6 }
 0x235   : > { %1756 = vmatmul.mubr.bf16.gmra.mrb[8].mxu0 %v827_v15 }
 0x236   : > { %1772 = vmatmul.mubr.bf16.gmra.mrb[8].mxu1 %v835_v16  ;;  %1759 = vmatprep.mubr.bf16.mxu0 %v828_v17 }
 0x237   : > { %1775 = vmatprep.mubr.bf16.mxu1 %v836_v18 }
 0x23d   : > { %1760 = vmatmul.mubr.bf16.gmra.mrb[12].mxu0 %v829_v23 }
 0x23e   : > { %1776 = vmatmul.mubr.bf16.gmra.mrb[12].mxu1 %v837_v24 }
 0x2f8   : > { %v1749_v26 = vpop.f32.mrb[0].mxu0 }
 0x2f9   : > { %v1765_v27 = vpop.f32.mrb[0].mxu1  ;;  %v952_v28 = vadd.f32 %v1749_v26, %v2660_v25  ;;  %v943_v30 = vpop.f32.mrb[1].mxu0 }
 0x2fa   : > { %v1016_v29 = vadd.f32 %v1765_v27, %v2660_v25  ;;  %v1007_v31 = vpop.f32.mrb[1].mxu1  ;;  %v944_v32 = vadd.f32 %v2660_v25, %v943_v30  ;;  %v1750_v34 = vpop.f32.mrb[2].mxu0 }
 0x2fb   : > { %v1008_v33 = vadd.f32 %v2660_v25, %v1007_v31  ;;  %v1766_v35 = vpop.f32.mrb[2].mxu1  ;;  %v955_v36 = vadd.f32 %v1750_v34, %v2660_v25  ;;  %v946_v38 = vpop.f32.mrb[3].mxu0  ;;  %v1072_v42 = vmax.f32 %v952_v28, 0.0 }
 0x2fc   : > { %v1019_v37 = vadd.f32 %v1766_v35, %v2660_v25  ;;  %v1010_v39 = vpop.f32.mrb[3].mxu1  ;;  %v947_v40 = vadd.f32 %v2660_v25, %v946_v38  ;;  %v1088_v43 = vmax.f32 %v1016_v29, 0.0  ;;  %v1070_v46 = vmax.f32 %v944_v32, 0.0 }
 0x2fd   : > { %v1011_v41 = vadd.f32 %v2660_v25, %v1010_v39  ;;  %v1073_v44 = vmax.f32 %v955_v36, 0.0  ;;  %v1086_v47 = vmax.f32 %v1008_v33, 0.0 }
 0x2fe   : > { %v1089_v45 = vmax.f32 %v1019_v37, 0.0  ;;  %v1071_v48 = vmax.f32 %v947_v40, 0.0 }
 0x2ff   : > { %v1087_v49 = vmax.f32 %v1011_v41, 0.0  ;;  %v1508_v50 = vpack.c.bf16 %v1073_v44, %v1072_v42 }
 0x300   : > { %v1548_v51 = vpack.c.bf16 %v1089_v45, %v1088_v43  ;;  %v1503_v52 = vpack.c.bf16 %v1071_v48, %v1070_v46  ;;  %v1753_v54 = vpop.f32.mrb[4].mxu0 }
 0x301   : > { %v1543_v53 = vpack.c.bf16 %v1087_v49, %v1086_v47  ;;  %v1769_v55 = vpop.f32.mrb[4].mxu1  ;;  %1580 = vst [vmem:[%s2619_s16 + $0x8] sm:$0xff] %v1508_v50   ;;  %v968_v56 = vadd.f32 %v1753_v54, %v2660_v25  ;;  %v959_v58 = vpop.f32.mrb[5].mxu0 }
 0x302   : > { %1588 = vst [vmem:[%s2619_s16 + $0x48] sm:$0xff] %v1548_v51   ;;  %v1032_v57 = vadd.f32 %v1769_v55, %v2660_v25  ;;  %v1023_v59 = vpop.f32.mrb[5].mxu1  ;;  %1504 = vst [vmem:[%s2619_s16] sm:$0xff] %v1503_v52   ;;  %v960_v60 = vadd.f32 %v2660_v25, %v959_v58  ;;  %v1754_v62 = vpop.f32.mrb[6].mxu0 }
 0x303   : > { %1587 = vst [vmem:[%s2619_s16 + $0x40] sm:$0xff] %v1543_v53   ;;  %v1024_v61 = vadd.f32 %v2660_v25, %v1023_v59  ;;  %v1770_v63 = vpop.f32.mrb[6].mxu1  ;;  %v971_v0 = vadd.f32 %v1754_v62, %v2660_v25  ;;  %v962_v2 = vpop.f32.mrb[7].mxu0  ;;  %v1076_v6 = vmax.f32 %v968_v56, 0.0 }
 0x304   : > { %v1035_v1 = vadd.f32 %v1770_v63, %v2660_v25  ;;  %v1026_v3 = vpop.f32.mrb[7].mxu1  ;;  %v963_v4 = vadd.f32 %v2660_v25, %v962_v2  ;;  %v1092_v7 = vmax.f32 %v1032_v57, 0.0  ;;  %v1074_v10 = vmax.f32 %v960_v60, 0.0 }
 0x305   : > { %v1027_v5 = vadd.f32 %v2660_v25, %v1026_v3  ;;  %v1077_v8 = vmax.f32 %v971_v0, 0.0  ;;  %v1090_v11 = vmax.f32 %v1024_v61, 0.0 }
 0x306   : > { %v1093_v9 = vmax.f32 %v1035_v1, 0.0  ;;  %v1075_v12 = vmax.f32 %v963_v4, 0.0 }
 0x307   : > { %v1091_v13 = vmax.f32 %v1027_v5, 0.0  ;;  %v1518_v14 = vpack.c.bf16 %v1077_v8, %v1076_v6 }
 0x308   : > { %v1558_v15 = vpack.c.bf16 %v1093_v9, %v1092_v7  ;;  %v1513_v16 = vpack.c.bf16 %v1075_v12, %v1074_v10  ;;  %v1757_v18 = vpop.f32.mrb[8].mxu0 }
 0x309   : > { %v1553_v17 = vpack.c.bf16 %v1091_v13, %v1090_v11  ;;  %v1773_v19 = vpop.f32.mrb[8].mxu1  ;;  %1582 = vst [vmem:[%s2619_s16 + $0x18] sm:$0xff] %v1518_v14   ;;  %v984_v20 = vadd.f32 %v1757_v18, %v2660_v25  ;;  %v975_v22 = vpop.f32.mrb[9].mxu0 }
 0x30a   : > { %1590 = vst [vmem:[%s2619_s16 + $0x58] sm:$0xff] %v1558_v15   ;;  %v1048_v21 = vadd.f32 %v1773_v19, %v2660_v25  ;;  %v1039_v23 = vpop.f32.mrb[9].mxu1  ;;  %1581 = vst [vmem:[%s2619_s16 + $0x10] sm:$0xff] %v1513_v16   ;;  %v976_v24 = vadd.f32 %v2660_v25, %v975_v22  ;;  %v1758_v27 = vpop.f32.mrb[10].mxu0 }
 0x30b   : > { %1589 = vst [vmem:[%s2619_s16 + $0x50] sm:$0xff] %v1553_v17   ;;  %v1040_v26 = vadd.f32 %v2660_v25, %v1039_v23  ;;  %v1774_v28 = vpop.f32.mrb[10].mxu1  ;;  %v987_v29 = vadd.f32 %v1758_v27, %v2660_v25  ;;  %v978_v31 = vpop.f32.mrb[11].mxu0  ;;  %v1080_v35 = vmax.f32 %v984_v20, 0.0 }
 0x30c   : > { %v1051_v30 = vadd.f32 %v1774_v28, %v2660_v25  ;;  %v1042_v32 = vpop.f32.mrb[11].mxu1  ;;  %v979_v33 = vadd.f32 %v2660_v25, %v978_v31  ;;  %v1096_v36 = vmax.f32 %v1048_v21, 0.0  ;;  %v1078_v39 = vmax.f32 %v976_v24, 0.0 }
 0x30d   : > { %v1043_v34 = vadd.f32 %v2660_v25, %v1042_v32  ;;  %v1081_v37 = vmax.f32 %v987_v29, 0.0  ;;  %v1094_v40 = vmax.f32 %v1040_v26, 0.0 }
 0x30e   : > { %v1097_v38 = vmax.f32 %v1051_v30, 0.0  ;;  %v1079_v41 = vmax.f32 %v979_v33, 0.0 }
 0x30f   : > { %v1095_v42 = vmax.f32 %v1043_v34, 0.0  ;;  %v1528_v43 = vpack.c.bf16 %v1081_v37, %v1080_v35 }
 0x310   : > { %v1568_v44 = vpack.c.bf16 %v1097_v38, %v1096_v36  ;;  %v1523_v45 = vpack.c.bf16 %v1079_v41, %v1078_v39  ;;  %v1761_v47 = vpop.f32.mrb[12].mxu0 }
 0x311   : > { %v1563_v46 = vpack.c.bf16 %v1095_v42, %v1094_v40  ;;  %v1777_v48 = vpop.f32.mrb[12].mxu1  ;;  %1584 = vst [vmem:[%s2619_s16 + $0x28] sm:$0xff] %v1528_v43   ;;  %v1000_v49 = vadd.f32 %v1761_v47, %v2660_v25  ;;  %v991_v51 = vpop.f32.mrb[13].mxu0 }
 0x312   : > { %1592 = vst [vmem:[%s2619_s16 + $0x68] sm:$0xff] %v1568_v44   ;;  %v1064_v50 = vadd.f32 %v1777_v48, %v2660_v25  ;;  %v1055_v52 = vpop.f32.mrb[13].mxu1  ;;  %1583 = vst [vmem:[%s2619_s16 + $0x20] sm:$0xff] %v1523_v45   ;;  %v992_v53 = vadd.f32 %v2660_v25, %v991_v51  ;;  %v1762_v55 = vpop.f32.mrb[14].mxu0 }
 0x313   : > { %1591 = vst [vmem:[%s2619_s16 + $0x60] sm:$0xff] %v1563_v46   ;;  %v1056_v54 = vadd.f32 %v2660_v25, %v1055_v52  ;;  %v1778_v56 = vpop.f32.mrb[14].mxu1  ;;  %v1003_v57 = vadd.f32 %v1762_v55, %v2660_v25  ;;  %v994_v59 = vpop.f32.mrb[15].mxu0  ;;  %v1084_v63 = vmax.f32 %v1000_v49, 0.0 }
 0x314   : > { %v1067_v58 = vadd.f32 %v1778_v56, %v2660_v25  ;;  %v1058_v60 = vpop.f32.mrb[15].mxu1  ;;  %v995_v61 = vadd.f32 %v2660_v25, %v994_v59  ;;  %v1100_v0 = vmax.f32 %v1064_v50, 0.0  ;;  %v1082_v3 = vmax.f32 %v992_v53, 0.0 }
 0x315   : > { %v1059_v62 = vadd.f32 %v2660_v25, %v1058_v60  ;;  %v1085_v1 = vmax.f32 %v1003_v57, 0.0  ;;  %v1098_v4 = vmax.f32 %v1056_v54, 0.0 }
 0x316   : > { %v1101_v2 = vmax.f32 %v1067_v58, 0.0  ;;  %v1083_v5 = vmax.f32 %v995_v61, 0.0 }
 0x317   : > { %v1099_v6 = vmax.f32 %v1059_v62, 0.0  ;;  %v1538_v7 = vpack.c.bf16 %v1085_v1, %v1084_v63 }
 0x318   : > { %v1578_v8 = vpack.c.bf16 %v1101_v2, %v1100_v0  ;;  %v1533_v9 = vpack.c.bf16 %v1083_v5, %v1082_v3 }
 0x319   : > { %v1573_v10 = vpack.c.bf16 %v1099_v6, %v1098_v4  ;;  %1586 = vst [vmem:[%s2619_s16 + $0x38] sm:$0xff] %v1538_v7  }
 0x31a   : > { %1594 = vst [vmem:[%s2619_s16 + $0x78] sm:$0xff] %v1578_v8   ;;  %1585 = vst [vmem:[%s2619_s16 + $0x30] sm:$0xff] %v1533_v9  }
 0x31b   : > { %1593 = vst [vmem:[%s2619_s16 + $0x70] sm:$0xff] %v1573_v10  }
 0x31c PF: > { %p2841_p10 = scmp.ne.s32.totalorder %s2816_s22, 0  ;;  %s1277_s1 = sshll.u32 %s2619_s16, 4  ;;  %s2716_s1 = int_to_ptr.vmem [resolvable:$true] %s1277_s1 }
 0x31d   : > { %s2842_s8 = sld [smem:[#allocation34_spill]]  ;;  %s2725_s10 = scalar_lea.sflag [#allocation10], %s303_s19 }
 0x31e   : > { %s1826_s25 = scalar_select %p2841_p10, [#allocation4], [#allocation18] }
 0x31f   : > { %s2870_s14 = smov (!%p2841_p10, %s2361_s14), 0  ;;  %s2106_s3 = scalar_lea.vmem %s2716_s1, 2048 }
 0x320   : > { %s1270_s21 = sld [smem:[%s1826_s25 + %s2870_s14]]  ;;  %p2107_p3 = scmp.ne.s32.totalorder %s2716_s1, %s2106_s3 }
 0x321   : > { %s2245_s14 = smov [#allocation14]  }
 0x322   : > { %p2108_p4 = pnand %p2107_p3, %p2841_p10  ;;  %s2110_s24 = sshll.u32 %s2245_s14, 4  ;;  %s2111_s24 = int_to_ptr.vmem [resolvable:$false] %s2110_s24 }
 0x323   : > { %s2112_s28 = scalar_lea.vmem %s2111_s24, 4096  ;;  %p2113_p2 = scmp.lt.s32.totalorder %s2716_s1, %s2111_s24 }
 0x324   : > { %p2109_p11 = pneg %p2108_p4  ;;  %p2114_p12 = scmp.lt.s32.totalorder %s2112_s28, %s2106_s3 }
 0x326   : > { %s1499_s26 = sshll.u32 %s1270_s21, 11  ;;  %p2115_p1 = por %p2114_p12, %p2113_p2 }
 0x327   : > { %s2721_s23 = scalar_lea.hbm %s2842_s8, %s1499_s26 }
 0x328   : > { %p2116_p0 = pnand %p2115_p1, %p2109_p11 }
 0x32a   : > { %2119 = shalt.err (!%p2116_p0)
}
 0x32b   : > { %s2120_s19 = scalar_lea.hbm %s2721_s23, 2048  ;;  %s2124_s16 = scalar_lea.hbm %s2842_s8, 6144 }
 0x32c   : > { %p2121_p9 = scmp.ne.s32.totalorder %s2721_s23, %s2120_s19  ;;  %p2125_p5 = scmp.lt.u32.totalorder %s2721_s23, %s2842_s8 }
 0x32d   : > { %p2126_p7 = scmp.lt.u32.totalorder %s2124_s16, %s2120_s19  ;;  %p2128_p3 = scmp.lt.u32.totalorder %s2120_s19, %s2721_s23 }
 0x32e   : > { %p2122_p13 = pnand %p2121_p9, %p2841_p10 }
 0x32f   : > { %p2127_p8 = por %p2126_p7, %p2125_p5 }
 0x330   : > { %p2123_p6 = pneg %p2122_p13 }
 0x331   : > { %p2129_p4 = por %p2128_p3, %p2127_p8 }
 0x333   : > { %p2130_p11 = pnand %p2129_p4, %p2123_p6 }
 0x335   : > { %2133 = shalt.err (!%p2130_p11)
}
 0x336   : > { %s2246_s2 = smov 64   ;;  %s2247_s25 = smov 4  }
 0x337   : > { %1828 = dma.vmem_to_hbm [thread:$0]  (%p2841_p10), %s2716_s1, 2048, %s2721_s23, %s2725_s10, %s2246_s2, %s2246_s2, %s2247_s25  }
 0x338 PF: > { %s2843_s21 = sld [smem:[#allocation27_spill]]  ;;  %s2844_s26 = sld [smem:[#allocation30_spill]] }
 0x339   : > { %p1854_p2 = scmp.ge.s32.totalorder %s2230_s13, 2 }
 0x33e   : > { %s1292_s15 = sand.u32 1, %s2843_s21   ;;  %p2845_p12 = scmp.ne.s32.totalorder %s2844_s26, 0 }
 0x33f   : > { %s1293_s17 = scalar_lea.sflag [#allocation10], %s1292_s15 }
 0x340   : > { %p1848_p1 = pnand %p1854_p2, %p2845_p12 }
 0x342   : > { %2189 = dma.done.wait (!%p1848_p1), %s1293_s17, 2048  }
 0x343   : > { %2191 = vsyncadd (!%p1848_p1), %s1293_s17, 4294965248  ;;  %s2846_s13 = sld [smem:[#allocation29_spill]]  ;;  %s2847_s14 = sld [smem:[#allocation28_spill]] }
 0x344   : > { %s2848_s28 = sld [smem:[#allocation31_spill]]  ;;  %s2849_s24 = smov %s2534_s29 }
 0x345   : > { %s2850_s22 = sld [smem:[#allocation32_spill]]  ;;  %s2851_s3 = smov %s2198_s27 }
 0x346   : > { %s2853_s29 = smov %s2210_s30  ;;  %s2854_s30 = smov %s2214_s9 }
 0x347   : > { %s2855_s9 = smov %s2849_s24  ;;  %s2856_s10 = smov %s2222_s11 }
 0x348   : > { %s2857_s11 = smov %s2226_s12 }
 0x349   : > { %p40_p10 = scmp.ge.s32.totalorder %s2846_s13, 9   ;;  %s2852_s27 = smov %s2847_s14 }
 0x34b   : > { %s2858_s12 = smov %s2850_s22  ;;  %42 = sbr.rel (!%p40_p10) target bundleno = 54 (0x36), region = 106 }
 0x352   :  { %1298 = vsyncpa [#allocation9], 1 }
 0x353   :  { %1300 = vsyncpa [#allocation9 + $0x1], 1 }
 0x354   :  { %1301 = vsyncpa [#allocation12], 1 }
 0x355   :  { %1303 = vsyncpa [#allocation12 + $0x1], 1 }
 0x356   :  { %1304 = vsyncpa [#allocation10], 1 }
 0x357   :  { %1306 = vsyncpa [#allocation10 + $0x1], 1 }

</bundles_post_ra>
